<compile_context>
chip_gen: v7x
topology: tpu7x:2x2x1
jax: 0.10.0
libtpu: 0.0.40
codegen_flags: <defaults>
</compile_context>

<pallas_src>
import functools

import numpy as np

import jax
import jax.numpy as jnp
from jax.experimental import pallas as pl
from jax.experimental.pallas import tpu as pltpu


def _astgcn_block_kernel(xall_ref, xtile_ref, satT_ref, chebT_ref, theta_ref,
                         wband_ref, wres_ref, bias_ref, gamma_ref, beta_ref,
                         bavg_ref, out_ref, *, eps, precision):
    # Per grid step (batch b, node tile j):
    #   xall_ref:  (1, N, T*F_in)        full node-major signal (graph-matmul RHS)
    #   xtile_ref: (1, nt, T*F_in)       this node tile's rows of x (residual conv input)
    #   satT_ref:  (1, nt, N)            rows of S^T for this node tile
    #   chebT_ref: (K, nt, N)            rows of T_k^T
    #   theta_ref: (K, T*F_in, T*F_chev) block-diagonal-in-time Theta_k
    #   wband_ref: (T*F_chev, Cout)      banded (1,3)/stride time-conv weight
    #   wres_ref:  (T*F_in,  Cout)       banded (1,1)/stride residual-conv weight
    #   bias/gamma/beta: (1, Cout)       per-column (= per F_time channel) rows
    #   bavg_ref:  (Cout, Cout)          block-averaging matrix for LayerNorm over F_time
    #   out_ref:   (1, nt, Cout)         lane-dense output slab, Cout = F_time*T_out
    dot = functools.partial(jnp.dot, precision=precision,
                            preferred_element_type=jnp.float32)
    K = chebT_ref.shape[0]

    x_all = xall_ref[0]                                   # (N, T*F_in)
    sat_t = satT_ref[0]                                   # (nt, N)

    # --- Chebyshev graph conv with spatial attention, all T time steps at once ---
    #   G[n, t*F_chev + o] = relu( sum_k ((T_k*S)^T @ X_all) @ Theta_bd_k )
    g_acc = None
    for k in range(K):
        p_k = dot(chebT_ref[k] * sat_t, x_all)            # (nt, T*F_in)
        term = dot(p_k, theta_ref[k])                     # (nt, T*F_chev)
        g_acc = term if g_acc is None else g_acc + term
    g = jnp.maximum(g_acc, 0.0)                           # (nt, T*F_chev)

    # --- banded time conv + banded residual conv + biases + ReLU (single lane-dense slab) ---
    z = dot(g, wband_ref[...]) + dot(xtile_ref[0], wres_ref[...]) + bias_ref[...]
    z = jnp.maximum(z, 0.0)                               # (nt, F_time*T_out)

    # --- LayerNorm over F_time via block-averaging matmul (cols ordered c*T_out + to) ---
    mu = dot(z, bavg_ref[...])
    d = z - mu
    var = dot(d * d, bavg_ref[...])
    out = d * jax.lax.rsqrt(var + eps) * gamma_ref[...] + beta_ref[...]
    out_ref[0] = out.astype(out_ref.dtype)


def _pick_node_block(n):
    # Largest sublane-aligned tile that still yields >=2 node tiles (pipelining and v7x
    # 2-TC megacore sharding); otherwise fall back to the full node dimension.
    for nt in (256, 128, 64, 32, 16, 8):
        if n % nt == 0 and n // nt >= 2:
            return nt
    return n


def _fused_cheb_tconv_ln(x, spatial_at, cheb_polys, theta, w_time, b_time,
                         w_res, b_res, gamma, beta, time_strides,
                         ln_eps=1e-5, node_block=None,
                         precision=jax.lax.Precision.DEFAULT):
    """cheb_conv_withSAt + time_conv + residual_conv + ReLU + LayerNorm, one pallas_call."""
    B, N, F_in, T = x.shape
    K = cheb_polys.shape[0]
    F_chev = theta.shape[-1]
    F_time = w_time.shape[0]
    ts = time_strides
    T_out = (T - 1) // ts + 1
    C_in, C_mid, C_out = T * F_in, T * F_chev, T_out * F_time

    if node_block is None:
        node_block = _pick_node_block(N)
    if N % node_block != 0:
        node_block = N
    n_tiles = N // node_block

    hi = jax.lax.Precision.HIGHEST   # weight prep is tiny & one-shot -> keep it exact

    # ---- host-side layout / weight prep (one pass each, no in-kernel transposes) ----
    # node-major input: x_nm[b, n, t*F_in + f] = x[b, n, f, t]
    x_nm = jnp.transpose(x, (0, 1, 3, 2)).reshape(B, N, C_in)
    sat_T = jnp.swapaxes(spatial_at, 1, 2)                # (B, N, N)  = S^T per batch
    cheb_T = jnp.swapaxes(cheb_polys, 1, 2)               # (K, N, N)  = T_k^T

    # Theta_bd[k, t*F_in+f, u*F_chev+o] = delta(t,u) * Theta_k[f,o]
    eye_t = jnp.eye(T, dtype=jnp.float32)
    theta_bd = jnp.einsum("tu,kfo->ktfuo", eye_t, theta).reshape(K, C_in, C_mid)

    # banded time-conv weight: W_band[tin*F_chev+o, c*T_out+to] = Wt[c,o,0,dt], tin=ts*to+dt-1
    sel = np.zeros((3, T, T_out), np.float32)
    for dt in range(3):
        for to in range(T_out):
            tin = ts * to + dt - 1
            if 0 <= tin < T:
                sel[dt, tin, to] = 1.0
    w_band = jnp.einsum("dit,cod->ioct", jnp.asarray(sel), w_time[:, :, 0, :],
                        precision=hi).reshape(C_mid, C_out)

    # banded residual weight: W_res_band[t*F_in+f, c*T_out+to] = Wr[c,f,0,0] iff t == ts*to
    sel_r = np.zeros((T, T_out), np.float32)
    for to in range(T_out):
        sel_r[ts * to, to] = 1.0
    w_res_band = jnp.einsum("it,cf->ifct", jnp.asarray(sel_r), w_res[:, :, 0, 0],
                            precision=hi).reshape(C_in, C_out)

    # per-column (c*T_out+to -> channel c) rows for bias / LayerNorm affine
    bias_row = jnp.repeat(b_time + b_res, T_out).reshape(1, C_out)
    gamma_row = jnp.repeat(gamma, T_out).reshape(1, C_out)
    beta_row = jnp.repeat(beta, T_out).reshape(1, C_out)

    # block-averaging matrix: mean over the F_time channels of each T_out block
    b_avg = jnp.kron(jnp.ones((F_time, F_time), jnp.float32),
                     jnp.eye(T_out, dtype=jnp.float32)) / float(F_time)

    kernel = functools.partial(_astgcn_block_kernel, eps=ln_eps, precision=precision)

    # Scoped-VMEM budget: only raise the limit when the resident operands demand it
    # (keeps headroom on v7x's 64 MiB physical VMEM; never triggers at the test sizes).
    resident = 4 * (K * C_in * C_mid + C_mid * C_out + C_in * C_out + 3 * C_out
                    + C_out * C_out)
    streamed = 4 * 2 * (N * C_in + node_block * C_in + (K + 1) * node_block * N
                        + node_block * C_out)
    cp_kwargs = dict(dimension_semantics=("parallel", "parallel"))
    vmem_est = resident + streamed
    if vmem_est > (16 << 20):
        cp_kwargs["vmem_limit_bytes"] = int(min(1.5 * vmem_est, 60 << 20))

    out = pl.pallas_call(
        kernel,
        out_shape=jax.ShapeDtypeStruct((B, N, C_out), x.dtype),
        grid_spec=pltpu.PrefetchScalarGridSpec(
            num_scalar_prefetch=0,
            grid=(B, n_tiles),
            in_specs=[
                pl.BlockSpec((1, N, C_in), lambda b, j: (b, 0, 0)),          # x (full nodes)
                pl.BlockSpec((1, node_block, C_in), lambda b, j: (b, j, 0)),  # x (node tile)
                pl.BlockSpec((1, node_block, N), lambda b, j: (b, j, 0)),     # S^T rows
                pl.BlockSpec((K, node_block, N), lambda b, j: (0, j, 0)),     # T_k^T rows
                pl.BlockSpec((K, C_in, C_mid), lambda b, j: (0, 0, 0)),       # Theta_bd
                pl.BlockSpec((C_mid, C_out), lambda b, j: (0, 0)),            # W_band
                pl.BlockSpec((C_in, C_out), lambda b, j: (0, 0)),             # W_res_band
                pl.BlockSpec((1, C_out), lambda b, j: (0, 0)),                # bias
                pl.BlockSpec((1, C_out), lambda b, j: (0, 0)),                # gamma
                pl.BlockSpec((1, C_out), lambda b, j: (0, 0)),                # beta
                pl.BlockSpec((C_out, C_out), lambda b, j: (0, 0)),            # B_avg
            ],
            out_specs=pl.BlockSpec((1, node_block, C_out), lambda b, j: (b, j, 0)),
        ),
        compiler_params=pltpu.CompilerParams(**cp_kwargs),
    )(x_nm, x_nm, sat_T, cheb_T, theta_bd, w_band, w_res_band,
      bias_row, gamma_row, beta_row, b_avg)

    # Columns are already ordered (F_time, T_out) -> plain (free) reshape, no HBM transpose.
    return out.reshape(B, N, F_time, T_out)


def astgcn_block_forward(x, params, cheb_polys, time_strides,
                         precision=jax.lax.Precision.DEFAULT, node_block=None):
    """Full ASTGCN_block forward: attention glue in XLA, heavy path in Pallas."""
    B, N, F_in, T = x.shape

    # --- Temporal attention (tiny) ---
    lhs = jnp.matmul(jnp.matmul(jnp.transpose(x, (0, 3, 2, 1)), params["U1"]), params["U2"])
    rhs = jnp.einsum("f,bnft->bnt", params["U3"], x)
    E = jnp.matmul(params["Ve"], jax.nn.sigmoid(jnp.matmul(lhs, rhs) + params["be"]))
    E_norm = jax.nn.softmax(E, axis=1)
    x_tat = jnp.matmul(x.reshape(B, -1, T), E_norm).reshape(B, N, F_in, T)

    # --- Spatial attention (tiny) ---
    lhs_s = jnp.matmul(jnp.matmul(x_tat, params["W1"]), params["W2"])
    rhs_s = jnp.einsum("f,bnft->btn", params["W3"], x_tat)
    S = jnp.matmul(params["Vs"], jax.nn.sigmoid(jnp.matmul(lhs_s, rhs_s) + params["bs"]))
    S_norm = jax.nn.softmax(S, axis=1)

    # --- Fused Pallas kernel: cheb conv w/ SAt + time conv + residual + ReLU + LayerNorm ---
    return _fused_cheb_tconv_ln(
        x, S_norm, cheb_polys, params["Theta"], params["Wt"], params["bt"],
        params["Wr"], params["br"], params["gamma"], params["beta"], time_strides,
        precision=precision, node_block=node_block)


def astgcn_block_reference(x, params, cheb_polys, time_strides):
    """Pure-JAX reference mirroring the PyTorch module."""
    B, N, F_in, T = x.shape
    # temporal attention
    lhs = jnp.matmul(jnp.matmul(jnp.transpose(x, (0, 3, 2, 1)), params["U1"]), params["U2"])
    rhs = jnp.einsum("f,bnft->bnt", params["U3"], x)
    E = jnp.matmul(params["Ve"], jax.nn.sigmoid(jnp.matmul(lhs, rhs) + params["be"]))
    E_norm = jax.nn.softmax(E, axis=1)
    x_tat = jnp.matmul(x.reshape(B, -1, T), E_norm).reshape(B, N, F_in, T)
    # spatial attention
    lhs_s = jnp.matmul(jnp.matmul(x_tat, params["W1"]), params["W2"])
    rhs_s = jnp.einsum("f,bnft->btn", params["W3"], x_tat)
    S = jnp.matmul(params["Vs"], jax.nn.sigmoid(jnp.matmul(lhs_s, rhs_s) + params["bs"]))
    S_norm = jax.nn.softmax(S, axis=1)
    # cheb conv with spatial attention (+ReLU)
    tk_at = cheb_polys[None, :, :, :] * S_norm[:, None, :, :]             # (B,K,N,N)
    gcn = jnp.einsum("bkmn,bmft,kfo->bnot", tk_at, x, params["Theta"])
    gcn = jnp.maximum(gcn, 0.0)                                           # (B,N,F_chev,T)
    # time conv + residual conv
    tc = jax.lax.conv_general_dilated(
        jnp.transpose(gcn, (0, 2, 1, 3)), params["Wt"],
        window_strides=(1, time_strides), padding=((0, 0), (1, 1)),
        dimension_numbers=("NCHW", "OIHW", "NCHW"))
    tc = tc + params["bt"][None, :, None, None]
    rc = jax.lax.conv_general_dilated(
        jnp.transpose(x, (0, 2, 1, 3)), params["Wr"],
        window_strides=(1, time_strides), padding=((0, 0), (0, 0)),
        dimension_numbers=("NCHW", "OIHW", "NCHW"))
    rc = rc + params["br"][None, :, None, None]
    z = jnp.maximum(rc + tc, 0.0)                                         # (B,F_time,N,T_out)
    z = jnp.transpose(z, (0, 3, 2, 1))                                    # (B,T_out,N,F_time)
    mu = jnp.mean(z, axis=-1, keepdims=True)
    var = jnp.mean((z - mu) ** 2, axis=-1, keepdims=True)
    z = (z - mu) / jnp.sqrt(var + 1e-5) * params["gamma"] + params["beta"]
    return jnp.transpose(z, (0, 2, 3, 1))                                 # (B,N,F_time,T_out)


if __name__ == "__main__":
    B, N, F_in, T = 2, 16, 4, 8
    K, F_chev, F_time, time_strides = 3, 8, 16, 1

    key = jax.random.PRNGKey(0)
    ks = jax.random.split(key, 18)

    x = jax.random.normal(ks[0], (B, N, F_in, T), dtype=jnp.float32)

    # Chebyshev polynomials T_0..T_{K-1} of a synthetic scaled Laplacian.
    a = jax.random.uniform(ks[1], (N, N), dtype=jnp.float32)
    a = 0.5 * (a + a.T)
    lap = jnp.diag(jnp.sum(a, axis=1)) - a
    lam_max = jnp.max(jnp.linalg.eigvalsh(lap))
    l_t = (2.0 / lam_max) * lap - jnp.eye(N, dtype=jnp.float32)
    polys = [jnp.eye(N, dtype=jnp.float32), l_t]
    for _ in range(2, K):
        polys.append(2.0 * l_t @ polys[-1] - polys[-2])
    cheb_polys = jnp.stack(polys[:K], axis=0)                 # (K, N, N)

    s = 0.1
    params = dict(
        # temporal attention
        U1=s * jax.random.normal(ks[2], (N,), jnp.float32),
        U2=s * jax.random.normal(ks[3], (F_in, N), jnp.float32),
        U3=s * jax.random.normal(ks[4], (F_in,), jnp.float32),
        be=s * jax.random.normal(ks[5], (1, T, T), jnp.float32),
        Ve=s * jax.random.normal(ks[6], (T, T), jnp.float32),
        # spatial attention
        W1=s * jax.random.normal(ks[7], (T,), jnp.float32),
        W2=s * jax.random.normal(ks[8], (F_in, T), jnp.float32),
        W3=s * jax.random.normal(ks[9], (F_in,), jnp.float32),
        bs=s * jax.random.normal(ks[10], (1, N, N), jnp.float32),
        Vs=s * jax.random.normal(ks[11], (N, N), jnp.float32),
        # cheb conv
        Theta=s * jax.random.normal(ks[12], (K, F_in, F_chev), jnp.float32),
        # time conv / residual conv
        Wt=s * jax.random.normal(ks[13], (F_time, F_chev, 1, 3), jnp.float32),
        bt=s * jax.random.normal(ks[14], (F_time,), jnp.float32),
        Wr=s * jax.random.normal(ks[15], (F_time, F_in, 1, 1), jnp.float32),
        br=s * jax.random.normal(ks[16], (F_time,), jnp.float32),
        # LayerNorm affine
        gamma=1.0 + s * jax.random.normal(ks[17], (F_time,), jnp.float32),
        beta=jnp.zeros((F_time,), jnp.float32),
    )

    t_out = (T - 1) // time_strides + 1

    # 1) strict semantic check: f32-accurate matmuls everywhere (kernel + glue + reference).
    with jax.default_matmul_precision("highest"):
        out_hi = astgcn_block_forward(x, params, cheb_polys, time_strides,
                                      precision=jax.lax.Precision.HIGHEST)
        out_hi = jax.block_until_ready(out_hi)
        ref = astgcn_block_reference(x, params, cheb_polys, time_strides)
        ref = jax.block_until_ready(ref)

    assert out_hi.shape == (B, N, F_time, t_out), out_hi.shape
    max_err = float(jnp.max(jnp.abs(out_hi - ref)))
    assert max_err < 1e-3, max_err

    # 2) production config from the perf review: DEFAULT matmul precision (single-pass bf16
    #    MXU with f32 accumulation).  LayerNorm can amplify bf16 rounding where the channel
    #    variance is tiny, so validate with a robust mean-abs-error bound instead of 1e-3.
    out_def = astgcn_block_forward(x, params, cheb_polys, time_strides)
    out_def = jax.block_until_ready(out_def)
    assert out_def.shape == (B, N, F_time, t_out), out_def.shape
    assert bool(jnp.all(jnp.isfinite(out_def)))
    mean_err = float(jnp.mean(jnp.abs(out_def - ref)))
    assert mean_err < 5e-2, mean_err

    print("KERNEL_OK")
</pallas_src>

<mosaic_0001>
module attributes {stable_mosaic.version = 11 : i64} {
  func.func @_astgcn_block_kernel(%arg0: i32, %arg1: i32, %arg2: memref<1x16x32xf32, #tpu.memory_space<vmem>>, %arg3: memref<1x8x32xf32, #tpu.memory_space<vmem>>, %arg4: memref<1x8x16xf32, #tpu.memory_space<vmem>>, %arg5: memref<3x8x16xf32, #tpu.memory_space<vmem>>, %arg6: memref<3x32x64xf32, #tpu.memory_space<vmem>>, %arg7: memref<64x128xf32, #tpu.memory_space<vmem>>, %arg8: memref<32x128xf32, #tpu.memory_space<vmem>>, %arg9: memref<1x128xf32, #tpu.memory_space<vmem>>, %arg10: memref<1x128xf32, #tpu.memory_space<vmem>>, %arg11: memref<1x128xf32, #tpu.memory_space<vmem>>, %arg12: memref<128x128xf32, #tpu.memory_space<vmem>>, %arg13: memref<1x8x128xf32, #tpu.memory_space<vmem>>) attributes {dimension_semantics = [#tpu.dimension_semantics<parallel>, #tpu.dimension_semantics<parallel>], iteration_bounds = array<i64: 2, 2>, scalar_prefetch = 0 : i64, scratch_operands = 0 : i64, tpu.core_type = #tpu.core_type<tc>, window_params = [{transform_indices = @transform_0, window_bounds = array<i64: 1, 16, 32>}, {transform_indices = @transform_1, window_bounds = array<i64: 1, 8, 32>}, {transform_indices = @transform_2, window_bounds = array<i64: 1, 8, 16>}, {transform_indices = @transform_3, window_bounds = array<i64: 3, 8, 16>}, {pipeline_mode = #tpu.pipeline_mode<synchronous>, transform_indices = @transform_4, window_bounds = array<i64: 3, 32, 64>}, {pipeline_mode = #tpu.pipeline_mode<synchronous>, transform_indices = @transform_5, window_bounds = array<i64: 64, 128>}, {pipeline_mode = #tpu.pipeline_mode<synchronous>, transform_indices = @transform_6, window_bounds = array<i64: 32, 128>}, {pipeline_mode = #tpu.pipeline_mode<synchronous>, transform_indices = @transform_7, window_bounds = array<i64: 1, 128>}, {pipeline_mode = #tpu.pipeline_mode<synchronous>, transform_indices = @transform_8, window_bounds = array<i64: 1, 128>}, {pipeline_mode = #tpu.pipeline_mode<synchronous>, transform_indices = @transform_9, window_bounds = array<i64: 1, 128>}, {pipeline_mode = #tpu.pipeline_mode<synchronous>, transform_indices = @transform_10, window_bounds = array<i64: 128, 128>}, {transform_indices = @transform_11, window_bounds = array<i64: 1, 8, 128>}]} {
    %c0 = arith.constant 0 : index
    %c0_0 = arith.constant 0 : index
    %c0_1 = arith.constant 0 : index
    %0 = vector.load %arg2[%c0, %c0_0, %c0_1] : memref<1x16x32xf32, #tpu.memory_space<vmem>>, vector<1x16x32xf32>
    %1 = vector.shape_cast %0 : vector<1x16x32xf32> to vector<16x32xf32>
    %c0_2 = arith.constant 0 : index
    %c0_3 = arith.constant 0 : index
    %c0_4 = arith.constant 0 : index
    %2 = vector.load %arg4[%c0_2, %c0_3, %c0_4] : memref<1x8x16xf32, #tpu.memory_space<vmem>>, vector<1x8x16xf32>
    %3 = vector.shape_cast %2 : vector<1x8x16xf32> to vector<8x16xf32>
    %c0_5 = arith.constant 0 : index
    %c0_6 = arith.constant 0 : index
    %c0_7 = arith.constant 0 : index
    %4 = vector.load %arg5[%c0_5, %c0_6, %c0_7] : memref<3x8x16xf32, #tpu.memory_space<vmem>>, vector<1x8x16xf32>
    %5 = vector.shape_cast %4 : vector<1x8x16xf32> to vector<8x16xf32>
    %6 = arith.mulf %5, %3 : vector<8x16xf32>
    %cst = arith.constant dense<0.000000e+00> : vector<8x32xf32>
    %7 = tpu.matmul %6, %1, %cst {dimension_numbers = #tpu.dot_dimension_numbers<[1], [0], [0], [1], [0, 0, 1, 1], [], []>, precision = #tpu.contract_precision<fp32>} : vector<8x16xf32>, vector<16x32xf32>, vector<8x32xf32> -> vector<8x32xf32>
    %c0_8 = arith.constant 0 : index
    %c0_9 = arith.constant 0 : index
    %c0_10 = arith.constant 0 : index
    %8 = vector.load %arg6[%c0_8, %c0_9, %c0_10] : memref<3x32x64xf32, #tpu.memory_space<vmem>>, vector<1x32x64xf32>
    %9 = vector.shape_cast %8 : vector<1x32x64xf32> to vector<32x64xf32>
    %cst_11 = arith.constant dense<0.000000e+00> : vector<8x64xf32>
    %10 = tpu.matmul %7, %9, %cst_11 {dimension_numbers = #tpu.dot_dimension_numbers<[1], [0], [0], [1], [0, 0, 1, 1], [], []>, precision = #tpu.contract_precision<fp32>} : vector<8x32xf32>, vector<32x64xf32>, vector<8x64xf32> -> vector<8x64xf32>
    %c1 = arith.constant 1 : index
    %c0_12 = arith.constant 0 : index
    %c0_13 = arith.constant 0 : index
    %11 = vector.load %arg5[%c1, %c0_12, %c0_13] : memref<3x8x16xf32, #tpu.memory_space<vmem>>, vector<1x8x16xf32>
    %12 = vector.shape_cast %11 : vector<1x8x16xf32> to vector<8x16xf32>
    %13 = arith.mulf %12, %3 : vector<8x16xf32>
    %cst_14 = arith.constant dense<0.000000e+00> : vector<8x32xf32>
    %14 = tpu.matmul %13, %1, %cst_14 {dimension_numbers = #tpu.dot_dimension_numbers<[1], [0], [0], [1], [0, 0, 1, 1], [], []>, precision = #tpu.contract_precision<fp32>} : vector<8x16xf32>, vector<16x32xf32>, vector<8x32xf32> -> vector<8x32xf32>
    %c1_15 = arith.constant 1 : index
    %c0_16 = arith.constant 0 : index
    %c0_17 = arith.constant 0 : index
    %15 = vector.load %arg6[%c1_15, %c0_16, %c0_17] : memref<3x32x64xf32, #tpu.memory_space<vmem>>, vector<1x32x64xf32>
    %16 = vector.shape_cast %15 : vector<1x32x64xf32> to vector<32x64xf32>
    %cst_18 = arith.constant dense<0.000000e+00> : vector<8x64xf32>
    %17 = tpu.matmul %14, %16, %cst_18 {dimension_numbers = #tpu.dot_dimension_numbers<[1], [0], [0], [1], [0, 0, 1, 1], [], []>, precision = #tpu.contract_precision<fp32>} : vector<8x32xf32>, vector<32x64xf32>, vector<8x64xf32> -> vector<8x64xf32>
    %18 = arith.addf %10, %17 : vector<8x64xf32>
    %c2 = arith.constant 2 : index
    %c0_19 = arith.constant 0 : index
    %c0_20 = arith.constant 0 : index
    %19 = vector.load %arg5[%c2, %c0_19, %c0_20] : memref<3x8x16xf32, #tpu.memory_space<vmem>>, vector<1x8x16xf32>
    %20 = vector.shape_cast %19 : vector<1x8x16xf32> to vector<8x16xf32>
    %21 = arith.mulf %20, %3 : vector<8x16xf32>
    %cst_21 = arith.constant dense<0.000000e+00> : vector<8x32xf32>
    %22 = tpu.matmul %21, %1, %cst_21 {dimension_numbers = #tpu.dot_dimension_numbers<[1], [0], [0], [1], [0, 0, 1, 1], [], []>, precision = #tpu.contract_precision<fp32>} : vector<8x16xf32>, vector<16x32xf32>, vector<8x32xf32> -> vector<8x32xf32>
    %c2_22 = arith.constant 2 : index
    %c0_23 = arith.constant 0 : index
    %c0_24 = arith.constant 0 : index
    %23 = vector.load %arg6[%c2_22, %c0_23, %c0_24] : memref<3x32x64xf32, #tpu.memory_space<vmem>>, vector<1x32x64xf32>
    %24 = vector.shape_cast %23 : vector<1x32x64xf32> to vector<32x64xf32>
    %cst_25 = arith.constant dense<0.000000e+00> : vector<8x64xf32>
    %25 = tpu.matmul %22, %24, %cst_25 {dimension_numbers = #tpu.dot_dimension_numbers<[1], [0], [0], [1], [0, 0, 1, 1], [], []>, precision = #tpu.contract_precision<fp32>} : vector<8x32xf32>, vector<32x64xf32>, vector<8x64xf32> -> vector<8x64xf32>
    %26 = arith.addf %18, %25 : vector<8x64xf32>
    %cst_26 = arith.constant 0.000000e+00 : f32
    %27 = vector.broadcast %cst_26 : f32 to vector<8x64xf32>
    %28 = arith.maximumf %26, %27 : vector<8x64xf32>
    %c0_27 = arith.constant 0 : index
    %c0_28 = arith.constant 0 : index
    %29 = vector.load %arg7[%c0_27, %c0_28] : memref<64x128xf32, #tpu.memory_space<vmem>>, vector<64x128xf32>
    %cst_29 = arith.constant dense<0.000000e+00> : vector<8x128xf32>
    %30 = tpu.matmul %28, %29, %cst_29 {dimension_numbers = #tpu.dot_dimension_numbers<[1], [0], [0], [1], [0, 0, 1, 1], [], []>, precision = #tpu.contract_precision<fp32>} : vector<8x64xf32>, vector<64x128xf32>, vector<8x128xf32> -> vector<8x128xf32>
    %c0_30 = arith.constant 0 : index
    %c0_31 = arith.constant 0 : index
    %c0_32 = arith.constant 0 : index
    %31 = vector.load %arg3[%c0_30, %c0_31, %c0_32] : memref<1x8x32xf32, #tpu.memory_space<vmem>>, vector<1x8x32xf32>
    %32 = vector.shape_cast %31 : vector<1x8x32xf32> to vector<8x32xf32>
    %c0_33 = arith.constant 0 : index
    %c0_34 = arith.constant 0 : index
    %33 = vector.load %arg8[%c0_33, %c0_34] : memref<32x128xf32, #tpu.memory_space<vmem>>, vector<32x128xf32>
    %cst_35 = arith.constant dense<0.000000e+00> : vector<8x128xf32>
    %34 = tpu.matmul %32, %33, %cst_35 {dimension_numbers = #tpu.dot_dimension_numbers<[1], [0], [0], [1], [0, 0, 1, 1], [], []>, precision = #tpu.contract_precision<fp32>} : vector<8x32xf32>, vector<32x128xf32>, vector<8x128xf32> -> vector<8x128xf32>
    %35 = arith.addf %30, %34 : vector<8x128xf32>
    %c0_36 = arith.constant 0 : index
    %c0_37 = arith.constant 0 : index
    %36 = vector.load %arg9[%c0_36, %c0_37] : memref<1x128xf32, #tpu.memory_space<vmem>>, vector<1x128xf32>
    %37 = vector.broadcast %36 : vector<1x128xf32> to vector<8x128xf32>
    %38 = arith.addf %35, %37 : vector<8x128xf32>
    %cst_38 = arith.constant 0.000000e+00 : f32
    %39 = vector.broadcast %cst_38 : f32 to vector<8x128xf32>
    %40 = arith.maximumf %38, %39 : vector<8x128xf32>
    %c0_39 = arith.constant 0 : index
    %c0_40 = arith.constant 0 : index
    %41 = vector.load %arg12[%c0_39, %c0_40] : memref<128x128xf32, #tpu.memory_space<vmem>>, vector<128x128xf32>
    %cst_41 = arith.constant dense<0.000000e+00> : vector<8x128xf32>
    %42 = tpu.matmul %40, %41, %cst_41 {dimension_numbers = #tpu.dot_dimension_numbers<[1], [0], [0], [1], [0, 0, 1, 1], [], []>, precision = #tpu.contract_precision<fp32>} : vector<8x128xf32>, vector<128x128xf32>, vector<8x128xf32> -> vector<8x128xf32>
    %43 = arith.subf %40, %42 : vector<8x128xf32>
    %44 = arith.mulf %43, %43 : vector<8x128xf32>
    %c0_42 = arith.constant 0 : index
    %c0_43 = arith.constant 0 : index
    %45 = vector.load %arg12[%c0_42, %c0_43] : memref<128x128xf32, #tpu.memory_space<vmem>>, vector<128x128xf32>
    %cst_44 = arith.constant dense<0.000000e+00> : vector<8x128xf32>
    %46 = tpu.matmul %44, %45, %cst_44 {dimension_numbers = #tpu.dot_dimension_numbers<[1], [0], [0], [1], [0, 0, 1, 1], [], []>, precision = #tpu.contract_precision<fp32>} : vector<8x128xf32>, vector<128x128xf32>, vector<8x128xf32> -> vector<8x128xf32>
    %cst_45 = arith.constant 9.99999974E-6 : f32
    %47 = vector.broadcast %cst_45 : f32 to vector<8x128xf32>
    %48 = arith.addf %46, %47 : vector<8x128xf32>
    %49 = math.rsqrt %48 : vector<8x128xf32>
    %50 = arith.mulf %43, %49 : vector<8x128xf32>
    %c0_46 = arith.constant 0 : index
    %c0_47 = arith.constant 0 : index
    %51 = vector.load %arg10[%c0_46, %c0_47] : memref<1x128xf32, #tpu.memory_space<vmem>>, vector<1x128xf32>
    %52 = vector.broadcast %51 : vector<1x128xf32> to vector<8x128xf32>
    %53 = arith.mulf %50, %52 : vector<8x128xf32>
    %c0_48 = arith.constant 0 : index
    %c0_49 = arith.constant 0 : index
    %54 = vector.load %arg11[%c0_48, %c0_49] : memref<1x128xf32, #tpu.memory_space<vmem>>, vector<1x128xf32>
    %55 = vector.broadcast %54 : vector<1x128xf32> to vector<8x128xf32>
    %56 = arith.addf %53, %55 : vector<8x128xf32>
    %c0_50 = arith.constant 0 : index
    %c0_51 = arith.constant 0 : index
    %c0_52 = arith.constant 0 : index
    %57 = vector.load %arg13[%c0_50, %c0_51, %c0_52] : memref<1x8x128xf32, #tpu.memory_space<vmem>>, vector<1x8x128xf32>
    %58 = vector.shape_cast %57 : vector<1x8x128xf32> to vector<8x128xf32>
    %59 = vector.shape_cast %56 : vector<8x128xf32> to vector<1x8x128xf32>
    tpu.vector_store %arg13[%c0_50, %c0_51, %c0_52], %59 {strides = array<i32>} : memref<1x8x128xf32, #tpu.memory_space<vmem>>, vector<1x8x128xf32>,
    return
  }
  func.func @transform_0(%arg0: i32, %arg1: i32) -> (i32, i32, i32) {
    %c0_i32 = arith.constant 0 : i32
    %c0_i32_0 = arith.constant 0 : i32
    %c0_i32_1 = arith.constant 0 : i32
    return %arg0, %c0_i32, %c0_i32_0 : i32, i32, i32
  }
  func.func @transform_1(%arg0: i32, %arg1: i32) -> (i32, i32, i32) {
    %c0_i32 = arith.constant 0 : i32
    %c0_i32_0 = arith.constant 0 : i32
    return %arg0, %arg1, %c0_i32 : i32, i32, i32
  }
  func.func @transform_2(%arg0: i32, %arg1: i32) -> (i32, i32, i32) {
    %c0_i32 = arith.constant 0 : i32
    %c0_i32_0 = arith.constant 0 : i32
    return %arg0, %arg1, %c0_i32 : i32, i32, i32
  }
  func.func @transform_3(%arg0: i32, %arg1: i32) -> (i32, i32, i32) {
    %c0_i32 = arith.constant 0 : i32
    %c0_i32_0 = arith.constant 0 : i32
    %c0_i32_1 = arith.constant 0 : i32
    return %c0_i32, %arg1, %c0_i32_0 : i32, i32, i32
  }
  func.func @transform_4(%arg0: i32, %arg1: i32) -> (i32, i32, i32) {
    %c0_i32 = arith.constant 0 : i32
    %c0_i32_0 = arith.constant 0 : i32
    %c0_i32_1 = arith.constant 0 : i32
    %c0_i32_2 = arith.constant 0 : i32
    return %c0_i32, %c0_i32_0, %c0_i32_1 : i32, i32, i32
  }
  func.func @transform_5(%arg0: i32, %arg1: i32) -> (i32, i32) {
    %c0_i32 = arith.constant 0 : i32
    %c0_i32_0 = arith.constant 0 : i32
    %c0_i32_1 = arith.constant 0 : i32
    return %c0_i32, %c0_i32_0 : i32, i32
  }
  func.func @transform_6(%arg0: i32, %arg1: i32) -> (i32, i32) {
    %c0_i32 = arith.constant 0 : i32
    %c0_i32_0 = arith.constant 0 : i32
    %c0_i32_1 = arith.constant 0 : i32
    return %c0_i32, %c0_i32_0 : i32, i32
  }
  func.func @transform_7(%arg0: i32, %arg1: i32) -> (i32, i32) {
    %c0_i32 = arith.constant 0 : i32
    %c0_i32_0 = arith.constant 0 : i32
    %c0_i32_1 = arith.constant 0 : i32
    return %c0_i32, %c0_i32_0 : i32, i32
  }
  func.func @transform_8(%arg0: i32, %arg1: i32) -> (i32, i32) {
    %c0_i32 = arith.constant 0 : i32
    %c0_i32_0 = arith.constant 0 : i32
    %c0_i32_1 = arith.constant 0 : i32
    return %c0_i32, %c0_i32_0 : i32, i32
  }
  func.func @transform_9(%arg0: i32, %arg1: i32) -> (i32, i32) {
    %c0_i32 = arith.constant 0 : i32
    %c0_i32_0 = arith.constant 0 : i32
    %c0_i32_1 = arith.constant 0 : i32
    return %c0_i32, %c0_i32_0 : i32, i32
  }
  func.func @transform_10(%arg0: i32, %arg1: i32) -> (i32, i32) {
    %c0_i32 = arith.constant 0 : i32
    %c0_i32_0 = arith.constant 0 : i32
    %c0_i32_1 = arith.constant 0 : i32
    return %c0_i32, %c0_i32_0 : i32, i32
  }
  func.func @transform_11(%arg0: i32, %arg1: i32) -> (i32, i32, i32) {
    %c0_i32 = arith.constant 0 : i32
    %c0_i32_0 = arith.constant 0 : i32
    return %arg0, %arg1, %c0_i32 : i32, i32, i32
  }
}

</mosaic_0001>

<bundles_post_ra>
// kernel: tpu_custom_call.1
= control target key start
LH: loop header
LB: loop body
LE: loop exit
PB: predicated region body
PF: predicated region fallthrough
CT: control target
= control target key end

     0   :  { %s10437_s0 = inlined_call_operand.hbm [shape: f32[2,16,32], index: 0, kind: input, shape index: {}]   ;;  %s10438_s1 = inlined_call_operand.hbm [shape: f32[2,16,32], index: 1, kind: input, shape index: {}]   ;;  %s10439_s2 = inlined_call_operand.hbm [shape: f32[2,16,16], index: 2, kind: input, shape index: {}]   ;;  %s10440_s3 = inlined_call_operand.hbm [shape: f32[3,16,16], index: 3, kind: input, shape index: {}]   ;;  %s10441_s4 = inlined_call_operand.hbm [shape: f32[3,32,64], index: 4, kind: input, shape index: {}]   ;;  %s10442_s5 = inlined_call_operand.hbm [shape: f32[64,128], index: 5, kind: input, shape index: {}]   ;;  %s10443_s6 = inlined_call_operand.hbm [shape: f32[32,128], index: 6, kind: input, shape index: {}]   ;;  %s10444_s7 = inlined_call_operand.vmem [shape: f32[1,128], index: 7, kind: input, shape index: {}]   ;;  %s10445_s8 = inlined_call_operand.vmem [shape: f32[1,128], index: 8, kind: input, shape index: {}]   ;;  %s10446_s9 = inlined_call_operand.vmem [shape: f32[1,128], index: 9, kind: input, shape index: {}]   ;;  %s10447_s10 = inlined_call_operand.hbm [shape: f32[128,128], index: 10, kind: input, shape index: {}]   ;;  %s10448_s11 = inlined_call_operand.hbm [shape: f32[2,16,128], index: 11, kind: output, shape index: {}]  }
   0x1   :  { %10499 = sst [smem:[#allocation40_spill]] %s10437_s0 }
   0x2   :  { %10500 = sst [smem:[#allocation41_spill]] %s10438_s1 }
   0x3   :  { %10501 = sst [smem:[#allocation42_spill]] %s10440_s3 }
   0x4   :  { %10502 = sst [smem:[#allocation43_spill]] %s10441_s4 }
   0x5   :  { %10503 = sst [smem:[#allocation44_spill]] %s10442_s5 }
   0x6   :  { %10504 = sst [smem:[#allocation45_spill]] %s10443_s6 }
   0x7   :  { %10505 = sst [smem:[#allocation46_spill]] %s10444_s7 }
   0x8   :  { %10506 = sst [smem:[#allocation47_spill]] %s10445_s8 }
   0x9   :  { %10507 = sst [smem:[#allocation48_spill]] %s10446_s9 }
   0xa   :  { %10508 = sst [smem:[#allocation49_spill]] %s10447_s10 }
   0xb   :  { %10509 = sst [smem:[#allocation50_spill]] %s10448_s11 }
   0xc   :  { %16 = vsyncpa [#allocation3], 0 }
   0xd   :  { %18 = vsyncpa [#allocation3 + $0x1], 0 }
   0xe   :  { %19 = vsyncpa [#allocation6], 0 }
   0xf   :  { %21 = vsyncpa [#allocation6 + $0x1], 0 }
  0x10   :  { %22 = vsyncpa [#allocation9], 0 }
  0x11   :  { %24 = vsyncpa [#allocation9 + $0x1], 0 }
  0x12   :  { %25 = vsyncpa [#allocation12], 0 }
  0x13   :  { %26 = vsyncpa [#allocation15], 0 }
  0x14   :  { %27 = vsyncpa [#allocation4], 0 }
  0x15   :  { %29 = vsyncpa [#allocation4 + $0x1], 0  ;;  %s8754_s17 = smov 0   ;;  %s8756_s18 = smov 0  }
  0x16   :  { %s8758_s19 = smov 0   ;;  %s8760_s20 = smov 0  }
  0x17   :  { %s8762_s21 = smov 0   ;;  %s8764_s22 = smov 0  }
  0x18   :  { %s8766_s23 = smov 0   ;;  %s8768_s24 = smov 0  }
  0x19   :  { %s8770_s25 = smov 0   ;;  %s8772_s26 = smov 0  }
  0x1a   :  { %s8774_s27 = smov 0   ;;  %s8776_s28 = smov 0  }
  0x1b   :  { %s8778_s29 = smov 0   ;;  %s8780_s30 = smov 0  }
  0x1c LB: > { %10510 = sst [smem:[#allocation24_spill]] %s8629_s18  ;;  %s8825_s12 = sadd.s32 4294967295, %s8677_s30   ;;  %s8677_s30 = sphi %s8780_s30, %s35_s30   ;;  %s8673_s29 = sphi %s8778_s29, %s10624_s29   ;;  %s8669_s28 = sphi %s8776_s28, %s10623_s28   ;;  %s8665_s27 = sphi %s8774_s27, %s10622_s27   ;;  %s8661_s26 = sphi %s8772_s26, %s10621_s26   ;;  %s8657_s25 = sphi %s8770_s25, %s10620_s25   ;;  %s8653_s24 = sphi %s8768_s24, %s10611_s24   ;;  %s8649_s23 = sphi %s8766_s23, %s10619_s23   ;;  %s8645_s22 = sphi %s8764_s22, %s10609_s22   ;;  %s8641_s21 = sphi %s8762_s21, %s10618_s21   ;;  %s8637_s20 = sphi %s8760_s20, %s10617_s20   ;;  %s8633_s19 = sphi %s8758_s19, %s10616_s19   ;;  %s8629_s18 = sphi %s8756_s18, %s10615_s18   ;;  %s8625_s17 = sphi %s8754_s17, %s10606_s17  }
  0x1d   : > { %10511 = sst [smem:[#allocation25_spill]] %s8637_s20  ;;  %p6053_p0 = scmp.ge.s32.totalorder %s8677_s30, 1 }
  0x1e   : > { %10512 = sst [smem:[#allocation26_spill]] %s8645_s22  ;;  %p10452_p1 = scmp.eq.s32.totalorder %s8825_s12, 0 }
  0x1f   : > { %10513 = sst [smem:[#allocation27_spill]] %s8649_s23  ;;  %p335_p2 = scmp.lt.s32.totalorder %s8677_s30, 5 }
  0x20   : > { %10514 = sst [smem:[#allocation28_spill]] %s8653_s24  ;;  %s8679_s14 = smov [#allocation10]  }
  0x21   : > { %10515 = sst [smem:[#allocation29_spill]] %s8657_s25  ;;  %p8830_p3 = pnand %p6053_p0, %p335_p2 }
  0x22   : > { %10516 = sst [smem:[#allocation30_spill]] %s8661_s26  ;;  %s347_s15 = sshll.u32 %s8679_s14, 4  ;;  %s348_s15 = int_to_ptr.vmem [resolvable:$true] %s347_s15 }
  0x23   : > { %10517 = sst [smem:[#allocation31_spill]] %s8665_s27  ;;  %p8115_p4 = pneg %p8830_p3 }
  0x24   : > { %s10518_s13 = scalar_select %p8830_p3, 1, 0 }
  0x25   : > { %p8838_p5 = pnand %p8115_p4, %p10452_p1  ;;  %s8680_s11 = smov [#allocation11]  }
  0x26   : > { %10519 = sst [smem:[#allocation32_spill]] %s10518_s13  ;;  %s360_s9 = sshll.u32 %s8680_s11, 4  ;;  %s8842_s9 = int_to_ptr.vmem [resolvable:$true] %s360_s9 }
  0x27   : > { %s10520_s16 = scalar_select %p8838_p5, 1, 0 }
  0x28   : > { %s10521_s4 = sld [smem:[#allocation43_spill]]  ;;  %p8852_p7 = pneg %p8838_p5 }
  0x2a   : > { %s10522_s14 = scalar_select %p8852_p7, 1, 0 }
  0x2e   : > { %s8279_s27 = scalar_lea.hbm %s10521_s4, 1536 }
  0x2f   : > { %p8280_p6 = scmp.ne.s32.totalorder %s10521_s4, %s8279_s27  ;;  %p8286_p10 = scmp.lt.u32.totalorder %s8279_s27, %s10521_s4 }
  0x31   : > { %p8282_p8 = pnand %p8852_p7, %p8280_p6 }
  0x33   : > { %p8283_p9 = pneg %p8282_p8 }
  0x35   : > { %p8288_p11 = pnand %p8286_p10, %p8283_p9 }
  0x37   : > { %8291 = shalt.err (!%p8288_p11)
}
  0x38   : > { %s8292_s8 = scalar_lea.vmem %s348_s15, 1536  ;;  %p8300_p2 = scmp.lt.s32.totalorder %s348_s15, %s348_s15 }
  0x39   : > { %p8293_p12 = scmp.ne.s32.totalorder %s348_s15, %s8292_s8  ;;  %p8301_p4 = scmp.lt.s32.totalorder %s8292_s8, %s8292_s8 }
  0x3b   : > { %p8295_p13 = pnand %p8293_p12, %p8852_p7  ;;  %p8302_p1 = por %p8301_p4, %p8300_p2 }
  0x3d   : > { %p8296_p0 = pneg %p8295_p13 }
  0x3f   : > { %p8303_p3 = pnand %p8302_p1, %p8296_p0 }
  0x41   : > { %8306 = shalt.err (!%p8303_p3)
}
  0x42   : > { %s10457_s3 = smov 128   ;;  %s10459_s7 = smov 8  }
  0x43   : > { %8118 = dma.hbm_to_vmem [thread:$0]  (!%p8838_p5), %s10521_s4, 1536, %s348_s15, [#allocation9], %s10457_s3, %s10457_s3, %s10459_s7  }
  0x44   : > { %s10523_s5 = sld [smem:[#allocation44_spill]] }
  0x4a   : > { %s8307_s0 = scalar_lea.hbm %s10523_s5, 1024 }
  0x4b   : > { %p8308_p1 = scmp.ne.s32.totalorder %s10523_s5, %s8307_s0  ;;  %p8314_p8 = scmp.lt.u32.totalorder %s8307_s0, %s10523_s5 }
  0x4d   : > { %p8310_p3 = pnand %p8308_p1, %p8852_p7 }
  0x4f   : > { %p8311_p6 = pneg %p8310_p3 }
  0x51   : > { %p8316_p9 = pnand %p8314_p8, %p8311_p6 }
  0x53   : > { %8319 = shalt.err (!%p8316_p9)
}
  0x54   : > { %s8320_s15 = scalar_lea.vmem %s8842_s9, 1024  ;;  %p8328_p13 = scmp.lt.s32.totalorder %s8842_s9, %s8842_s9 }
  0x55   : > { %p8321_p10 = scmp.ne.s32.totalorder %s8842_s9, %s8320_s15  ;;  %p8329_p0 = scmp.lt.s32.totalorder %s8320_s15, %s8320_s15 }
  0x57   : > { %p8323_p11 = pnand %p8321_p10, %p8852_p7  ;;  %p8330_p2 = por %p8329_p0, %p8328_p13 }
  0x59   : > { %p8324_p12 = pneg %p8323_p11 }
  0x5b   : > { %p8331_p4 = pnand %p8330_p2, %p8324_p12 }
  0x5d   : > { %8334 = shalt.err (!%p8331_p4)
}
  0x5e   : > { %8121 = dma.hbm_to_vmem [thread:$0]  (!%p8838_p5), %s10523_s5, 1024, %s8842_s9, [#allocation12], %s10457_s3, %s10457_s3, %s10459_s7  }
  0x5f   : > { %s44_s24 = sadd.s32 1, %s8669_s28  ;;  %s47_s25 = sadd.s32 1, %s8673_s29 }
  0x60   : > { %p45_p1 = scmp.ge.s32.totalorder %s44_s24, 2  ;;  %s6052_s26 = sadd.s32 4294967294, %s8677_s30  }
  0x61   : > { %p10464_p3 = scmp.eq.s32.totalorder %s8677_s30, 0  ;;  %p10461_p8 = scmp.ne.s32.totalorder %s8641_s21, %s8637_s20 }
  0x62   : > { %s10626_s24 = smov (%p45_p1, %s44_s24), 0  ;;  %s10628_s25 = smov (!%p45_p1, %s47_s25), %s8673_s29 }
  0x63   : > { %10524 = sst [smem:[#allocation33_spill]] %s10626_s24  ;;  %s78_s27 = ssub.s32 %s8669_s28, %s10626_s24 }
  0x64   : > { %p49_p6 = scmp.ge.s32.totalorder %s10628_s25, 2  ;;  %s82_s9 = sadd.s32 1, %s8645_s22 }
  0x65   : > { %p10462_p9 = scmp.ne.s32.totalorder %s8645_s22, %s8641_s21  ;;  %p10526_p10 = scmp.eq.s32.totalorder %s8825_s12, 0 }
  0x66   : > { %s10630_s25 = smov (%p49_p6, %s10628_s25), 0  ;;  %p134_p12 = scmp.eq.s32.totalorder %s78_s27, 0 }
  0x67   : > { %10525 = sst [smem:[#allocation34_spill]] %s10630_s25  ;;  %p8918_p11 = por %p10461_p8, %p10526_p10 }
  0x68   : > { %s8924_s11 = ssub.s32 %s8673_s29, %s10630_s25  ;;  %s136_s8 = sadd.s32 1, %s8633_s19 }
  0x69   : > { %s10527_s13 = scalar_select %p8918_p11, 1, 0 }
  0x6a   : > { %s79_s15 = sor.u32 %s78_s27, %s8924_s11  ;;  %p8933_p13 = por %p10462_p9, %p10464_p3 }
  0x6b   : > { %p80_p0 = scmp.eq.s32.totalorder %s79_s15, 0  ;;  %p143_p2 = scmp.ne.s32.totalorder %s8633_s19, %s8629_s18 }
  0x6c   : > { %s8940_s23 = scalar_select %p134_p12, %s8633_s19, %s136_s8  }
  0x6d   : > { %s8943_s3 = scalar_select %p80_p0, %s8645_s22, %s82_s9  }
  0x6e   : > { %10529 = sst [smem:[#allocation35_spill]] %s8940_s23  ;;  %p149_p4 = scmp.ne.s32.totalorder %s8629_s18, %s8625_s17 }
  0x6f   : > { %10530 = sst [smem:[#allocation36_spill]] %s8943_s3  ;;  %p322_p1 = scmp.eq.s32.totalorder %s8825_s12, 3 }
  0x70   : > { %p8950_p6 = por %p143_p2, %p10464_p3  ;;  %p328_p10 = scmp.eq.s32.totalorder %s6052_s26, 3 }
  0x71   : > { %p10532_p8 = scmp.eq.s32.totalorder %s8825_s12, 0  ;;  %p10535_p12 = scmp.ne.s32.totalorder %s8645_s22, %s8641_s21 }
  0x72   : > { %p10538_p0 = scmp.ne.s32.totalorder %s8641_s21, %s8637_s20  ;;  %p10475_p3 = scmp.lt.s32.totalorder %s8677_s30, 4 }
  0x73   : > { %p8956_p9 = por %p149_p4, %p10532_p8  ;;  %p8963_p11 = por %p322_p1, %p10535_p12 }
  0x74   : > { %p8970_p2 = por %p328_p10, %p10538_p0  ;;  %s10482_s8 = sand.u32 1, %s8677_s30  }
  0x75   : > { %s10533_s27 = scalar_select %p8956_p9, 1, 0 }
  0x76   : > { %s10536_s9 = scalar_select %p8963_p11, 1, 0 }
  0x77   : > { %10534 = sst [smem:[#allocation37_spill]] %s10533_s27  ;;  %s432_s26 = sand.u32 1, %s8645_s22  }
  0x78   : > { %10537 = sst [smem:[#allocation38_spill]] %s10536_s9  ;;  %s8977_s15 = sshll.u32 %s432_s26, 3 }
  0x79   : > { %s10539_s17 = scalar_select %p8970_p2, 1, 0 }
  0x7a   : > { %s6063_s4 = sshll.u32 %s8673_s29, 1  ;;  %s434_s24 = scalar_lea.vmem [#allocation5], %s8977_s15 }
  0x7b   : > { %10540 = sst [smem:[#allocation39_spill]] %s10539_s17  ;;  %s439_s5 = sadd.s32 %s8669_s28, %s6063_s4 }
  0x7c   : > { %s6064_s25 = sshll.u32 %s439_s5, 7  ;;  %s443_s3 = sshll.u32 %s434_s24, 4  ;;  %s8987_s3 = int_to_ptr.vmem [resolvable:$true] %s443_s3 }
  0x7d   : > { %s10541_s1 = sld [smem:[#allocation41_spill]]  ;;  %p8993_p8 = pnand %p10475_p3, %p8933_p13 }
  0x7e   : > { %s9001_s24 = scalar_lea.hbm %s10439_s2, %s6064_s25  ;;  %s9005_s23 = scalar_lea.sflag [#allocation6], %s10482_s8 }
  0x7f   : > { %s10542_s26 = scalar_select %p8993_p8, 1, 0 }
  0x80   : > { %p10483_p10 = pneg %p8993_p8 }
  0x83   : > { %s8985_s20 = scalar_lea.hbm %s10541_s1, %s6064_s25  ;;  %s8340_s17 = scalar_lea.hbm %s10541_s1, 512 }
  0x84   : > { %s8335_s27 = scalar_lea.hbm %s8985_s20, 128  ;;  %p8341_p0 = scmp.lt.u32.totalorder %s8985_s20, %s10541_s1 }
  0x85   : > { %p8336_p1 = scmp.ne.s32.totalorder %s8985_s20, %s8335_s27  ;;  %p8342_p4 = scmp.lt.u32.totalorder %s8340_s17, %s8335_s27 }
  0x86   : > { %p8344_p2 = scmp.lt.u32.totalorder %s8335_s27, %s8985_s20 }
  0x87   : > { %p8338_p13 = pnand %p10483_p10, %p8336_p1  ;;  %p8343_p3 = por %p8342_p4, %p8341_p0 }
  0x89   : > { %p8339_p12 = pneg %p8338_p13  ;;  %p8345_p11 = por %p8344_p2, %p8343_p3 }
  0x8b   : > { %p8346_p9 = pnand %p8345_p11, %p8339_p12 }
  0x8d   : > { %8349 = shalt.err (!%p8346_p9)
}
  0x8e   : > { %s8350_s25 = scalar_lea.vmem %s8987_s3, 128  ;;  %s8683_s22 = smov [#allocation5]  }
  0x8f   : > { %p8351_p1 = scmp.ne.s32.totalorder %s8987_s3, %s8350_s25  ;;  %s8355_s4 = sshll.u32 %s8683_s22, 4  ;;  %s8356_s4 = int_to_ptr.vmem [resolvable:$false] %s8355_s4 }
  0x90   : > { %s8357_s18 = scalar_lea.vmem %s8356_s4, 256  ;;  %p8358_p7 = scmp.lt.s32.totalorder %s8987_s3, %s8356_s4 }
  0x91   : > { %p8353_p13 = pnand %p8351_p1, %p10483_p10  ;;  %p8359_p4 = scmp.lt.s32.totalorder %s8357_s18, %s8350_s25 }
  0x93   : > { %p8354_p5 = pneg %p8353_p13  ;;  %p8360_p0 = por %p8359_p4, %p8358_p7 }
  0x95   : > { %p8361_p3 = pnand %p8360_p0, %p8354_p5 }
  0x97   : > { %8364 = shalt.err (!%p8361_p3)
}
  0x98   : > { %8134 = dma.hbm_to_vmem [thread:$0]  (!%p8993_p8), %s8985_s20, 128, %s8987_s3, %s9005_s23  }
  0x99   : > { %p10543_p9 = scmp.lt.s32.totalorder %s8677_s30, 4  ;;  %s8684_s5 = smov [#allocation13]  }
  0x9a   : > { %s373_s27 = sshll.u32 %s8684_s5, 4  ;;  %s8685_s0 = smov [#allocation14]   ;;  %s374_s27 = int_to_ptr.vmem [resolvable:$true] %s373_s27 }
  0x9b   : > { %p9038_p11 = pnand %p10543_p9, %p8950_p6  ;;  %s395_s25 = sshll.u32 %s8685_s0, 4  ;;  %s396_s25 = int_to_ptr.vmem [resolvable:$true] %s395_s25 }
  0x9c   : > { %s10545_s6 = sld [smem:[#allocation45_spill]]  ;;  %p10546_p7 = scmp.ne.s32.totalorder %s10522_s14, 0 }
  0x9d   : > { %s10544_s17 = scalar_select %p9038_p11, 1, 0 }
  0xa2   : > { %s8365_s18 = scalar_lea.hbm %s10545_s6, 512 }
  0xa3   : > { %p8366_p5 = scmp.ne.s32.totalorder %s10545_s6, %s8365_s18  ;;  %p8372_p6 = scmp.lt.u32.totalorder %s8365_s18, %s10545_s6 }
  0xa5   : > { %p8368_p2 = pnand %p8366_p5, %p10546_p7 }
  0xa7   : > { %p8369_p12 = pneg %p8368_p2 }
  0xa9   : > { %p8374_p1 = pnand %p8372_p6, %p8369_p12 }
  0xab   : > { %8377 = shalt.err (!%p8374_p1)
}
  0xac   : > { %s8378_s7 = scalar_lea.vmem %s374_s27, 512  ;;  %p8386_p3 = scmp.lt.s32.totalorder %s374_s27, %s374_s27 }
  0xad   : > { %p8379_p13 = scmp.ne.s32.totalorder %s374_s27, %s8378_s7  ;;  %p8387_p9 = scmp.lt.s32.totalorder %s8378_s7, %s8378_s7 }
  0xaf   : > { %p8381_p4 = pnand %p8379_p13, %p10546_p7  ;;  %p8388_p10 = por %p8387_p9, %p8386_p3 }
  0xb1   : > { %p8382_p0 = pneg %p8381_p4 }
  0xb3   : > { %p8389_p11 = pnand %p8388_p10, %p8382_p0 }
  0xb5   : > { %8392 = shalt.err (!%p8389_p11)
}
  0xb6   : > { %p10547_p5 = scmp.ne.s32.totalorder %s10520_s16, 0  ;;  %s10548_s1 = smov 8  }
  0xb7   : > { %s10549_s8 = smov 128   ;;  %s10550_s10 = sld [smem:[#allocation49_spill]] }
  0xb8   : > { %8124 = dma.hbm_to_vmem [thread:$0]  (!%p10547_p5), %s10545_s6, 512, %s374_s27, [#allocation12], %s10549_s8, %s10549_s8, %s10548_s1  }
  0xbd   : > { %s8393_s18 = scalar_lea.hbm %s10550_s10, 2048 }
  0xbe   : > { %p8394_p10 = scmp.ne.s32.totalorder %s10550_s10, %s8393_s18  ;;  %p8400_p12 = scmp.lt.u32.totalorder %s8393_s18, %s10550_s10 }
  0xc0   : > { %p8396_p11 = pnand %p8394_p10, %p10546_p7 }
  0xc2   : > { %p8397_p2 = pneg %p8396_p11 }
  0xc4   : > { %p8402_p6 = pnand %p8400_p12, %p8397_p2 }
  0xc6   : > { %8405 = shalt.err (!%p8402_p6)
}
  0xc7   : > { %s8406_s5 = scalar_lea.vmem %s396_s25, 2048  ;;  %p8414_p0 = scmp.lt.s32.totalorder %s396_s25, %s396_s25 }
  0xc8   : > { %p8407_p1 = scmp.ne.s32.totalorder %s396_s25, %s8406_s5  ;;  %p8415_p3 = scmp.lt.s32.totalorder %s8406_s5, %s8406_s5 }
  0xca   : > { %p8409_p13 = pnand %p8407_p1, %p10546_p7  ;;  %p8416_p9 = por %p8415_p3, %p8414_p0 }
  0xcc   : > { %p8410_p4 = pneg %p8409_p13 }
  0xce   : > { %p8417_p8 = pnand %p8416_p9, %p8410_p4 }
  0xd0   : > { %8420 = shalt.err (!%p8417_p8)
}
  0xd1   : > { %s10551_s0 = sld [smem:[#allocation29_spill]]  ;;  %s10552_s22 = sld [smem:[#allocation28_spill]] }
  0xd2   : > { %s10553_s14 = sld [smem:[#allocation27_spill]]  ;;  %p10554_p8 = scmp.eq.s32.totalorder %s8924_s11, 0 }
  0xd3   : > { %8127 = dma.hbm_to_vmem [thread:$0]  (!%p10547_p5), %s10550_s10, 2048, %s396_s25, [#allocation15], %s10549_s8, %s10549_s8, %s10548_s1  }
  0xd4   : > { %s6088_s20 = sshll.u32 %s8673_s29, 8  ;;  %p10555_p11 = scmp.eq.s32.totalorder %s8677_s30, 0 }
  0xd5   : > { %p10556_p12 = scmp.eq.s32.totalorder %s8825_s12, 0  ;;  %s10558_s27 = sld [smem:[#allocation40_spill]] }
  0xd6   : > { %p10560_p5 = scmp.lt.s32.totalorder %s8677_s30, 4 }
  0xd7   : > { %s54_s16 = sadd.s32 1, %s10551_s0  ;;  %p61_p7 = scmp.ne.s32.totalorder %s10551_s0, %s10552_s22 }
  0xd8   : > { %s9088_s4 = scalar_select %p10554_p8, %s10551_s0, %s54_s16  }
  0xd9   : > { %p67_p10 = scmp.ne.s32.totalorder %s10552_s22, %s10553_s14  ;;  %s409_s18 = sand.u32 1, %s10551_s0  }
  0xda   : > { %p63_p2 = por %p10555_p11, %p61_p7  ;;  %s6059_s7 = sshll.u32 %s409_s18, 4 }
  0xdb   : > { %p9100_p6 = por %p10556_p12, %p67_p10  ;;  %s10559_s6 = smov %s10558_s27 }
  0xdc   : > { %s9107_s25 = scalar_lea.hbm %s10558_s27, %s6088_s20  ;;  %s413_s11 = scalar_lea.vmem [#allocation2], %s6059_s7 }
  0xdd   : > { %s420_s22 = sshll.u32 %s413_s11, 4  ;;  %p9111_p1 = pnand %p10560_p5, %p63_p2  ;;  %s9115_s22 = int_to_ptr.vmem [resolvable:$true] %s420_s22 }
  0xde   : > { %s454_s14 = scalar_lea.vmem [#allocation7], %s8977_s15  ;;  %s9120_s20 = scalar_lea.sflag [#allocation3], %s409_s18 }
  0xdf   : > { %s463_s16 = sshll.u32 %s454_s14, 4  ;;  %s8421_s5 = scalar_lea.hbm %s9107_s25, 256  ;;  %s9118_s16 = int_to_ptr.vmem [resolvable:$true] %s463_s16 }
  0xe0   : > { %p8422_p13 = scmp.ne.s32.totalorder %s9107_s25, %s8421_s5  ;;  %p8423_p4 = pneg %p9111_p1 }
  0xe1   : > { %s8426_s27 = scalar_lea.hbm %s10559_s6, 512  ;;  %p8427_p9 = scmp.lt.u32.totalorder %s9107_s25, %s10559_s6 }
  0xe2   : > { %p8424_p0 = pnand %p8423_p4, %p8422_p13  ;;  %p8428_p8 = scmp.lt.u32.totalorder %s8426_s27, %s8421_s5 }
  0xe3   : > { %p8430_p10 = scmp.lt.u32.totalorder %s8421_s5, %s9107_s25 }
  0xe4   : > { %p8425_p3 = pneg %p8424_p0  ;;  %p8429_p7 = por %p8428_p8, %p8427_p9 }
  0xe6   : > { %p8431_p11 = por %p8430_p10, %p8429_p7 }
  0xe8   : > { %p8432_p2 = pnand %p8431_p11, %p8425_p3 }
  0xea   : > { %8435 = shalt.err (!%p8432_p2)
}
  0xeb   : > { %s8436_s15 = scalar_lea.vmem %s9115_s22, 256  ;;  %s8686_s18 = smov [#allocation2]  }
  0xec   : > { %p8437_p12 = scmp.ne.s32.totalorder %s9115_s22, %s8436_s15  ;;  %s8441_s14 = sshll.u32 %s8686_s18, 4  ;;  %s8442_s14 = int_to_ptr.vmem [resolvable:$false] %s8441_s14 }
  0xed   : > { %s8443_s10 = scalar_lea.vmem %s8442_s14, 512  ;;  %p8444_p0 = scmp.lt.s32.totalorder %s9115_s22, %s8442_s14 }
  0xee   : > { %p8439_p5 = pnand %p8437_p12, %p8423_p4  ;;  %p8445_p9 = scmp.lt.s32.totalorder %s8443_s10, %s8436_s15 }
  0xf0   : > { %p8440_p13 = pneg %p8439_p5  ;;  %p8446_p8 = por %p8445_p9, %p8444_p0 }
  0xf2   : > { %p8447_p7 = pnand %p8446_p8, %p8440_p13 }
  0xf4   : > { %8450 = shalt.err (!%p8447_p7)
}
  0xf5   : > { %8131 = dma.hbm_to_vmem [thread:$0]  (!%p9111_p1), %s9107_s25, 256, %s9115_s22, %s9120_s20, %s10549_s8, %s10549_s8, %s10548_s1  }
  0xf6   : > { %s8451_s5 = scalar_lea.hbm %s9001_s24, 128  ;;  %p10562_p3 = scmp.ne.s32.totalorder %s10542_s26, 0 }
  0xf7   : > { %p8452_p4 = scmp.ne.s32.totalorder %s9001_s24, %s8451_s5  ;;  %s8456_s9 = scalar_lea.hbm %s10439_s2, 512 }
  0xf8   : > { %p10563_p10 = pneg %p10562_p3  ;;  %p8457_p12 = scmp.lt.u32.totalorder %s9001_s24, %s10439_s2 }
  0xf9   : > { %p8458_p5 = scmp.lt.u32.totalorder %s8456_s9, %s8451_s5  ;;  %p8460_p0 = scmp.lt.u32.totalorder %s8451_s5, %s9001_s24 }
  0xfa   : > { %p8454_p11 = pnand %p8452_p4, %p10563_p10 }
  0xfb   : > { %p8459_p13 = por %p8458_p5, %p8457_p12 }
  0xfc   : > { %p8455_p2 = pneg %p8454_p11 }
  0xfd   : > { %p8461_p9 = por %p8460_p0, %p8459_p13 }
  0xff   : > { %p8462_p8 = pnand %p8461_p9, %p8455_p2 }
 0x101   : > { %8465 = shalt.err (!%p8462_p8)
}
 0x102   : > { %s8466_s25 = scalar_lea.vmem %s9118_s16, 128  ;;  %p10564_p7 = pmov %p10563_p10 }
 0x103   : > { %p8467_p1 = scmp.ne.s32.totalorder %s9118_s16, %s8466_s25  ;;  %s8687_s22 = smov [#allocation7]  }
 0x104   : > { %s8471_s20 = sshll.u32 %s8687_s22, 4  ;;  %s8472_s20 = int_to_ptr.vmem [resolvable:$false] %s8471_s20 }
 0x105   : > { %p8469_p4 = pnand %p8467_p1, %p10564_p7  ;;  %s8473_s15 = scalar_lea.vmem %s8472_s20, 256 }
 0x106   : > { %p8474_p11 = scmp.lt.s32.totalorder %s9118_s16, %s8472_s20  ;;  %p8475_p12 = scmp.lt.s32.totalorder %s8473_s15, %s8466_s25 }
 0x107   : > { %p8470_p10 = pneg %p8469_p4 }
 0x108   : > { %p8476_p5 = por %p8475_p12, %p8474_p11 }
 0x10a   : > { %p8477_p13 = pnand %p8476_p5, %p8470_p10 }
 0x10c   : > { %8480 = shalt.err (!%p8477_p13)
}
 0x10d   : > { %8137 = dma.hbm_to_vmem [thread:$0]  (!%p10562_p3), %s9001_s24, 128, %s9118_s16, %s9005_s23  }
 0x10e   : > { %s472_s18 = sand.u32 1, %s8633_s19   ;;  %s10565_s10 = sshll.u32 %s8669_s28, 7 }
 0x10f   : > { %s8087_s14 = smul.u32 24, %s472_s18  ;;  %s10566_s0 = sld [smem:[#allocation42_spill]] }
 0x110   : > { %s10567_s11 = sand.u32 1, %s8677_s30   ;;  %p10568_p2 = scmp.ne.s32.totalorder %s10544_s17, 0 }
 0x111   : > { %s474_s26 = scalar_lea.vmem [#allocation8], %s8087_s14  ;;  %s9187_s25 = scalar_lea.sflag [#allocation9], %s10567_s11 }
 0x112   : > { %s480_s27 = sshll.u32 %s474_s26, 4  ;;  %p8483_p0 = pneg %p10568_p2  ;;  %s9183_s27 = int_to_ptr.vmem [resolvable:$true] %s480_s27 }
 0x115   : > { %s9181_s9 = scalar_lea.hbm %s10566_s0, %s10565_s10  ;;  %s8486_s22 = scalar_lea.hbm %s10566_s0, 768 }
 0x116   : > { %s8481_s24 = scalar_lea.hbm %s9181_s9, 384  ;;  %p8487_p1 = scmp.lt.u32.totalorder %s9181_s9, %s10566_s0 }
 0x117   : > { %p8482_p3 = scmp.ne.s32.totalorder %s9181_s9, %s8481_s24  ;;  %p8488_p7 = scmp.lt.u32.totalorder %s8486_s22, %s8481_s24 }
 0x118   : > { %p8490_p10 = scmp.lt.u32.totalorder %s8481_s24, %s9181_s9 }
 0x119   : > { %p8484_p9 = pnand %p8483_p0, %p8482_p3  ;;  %p8489_p4 = por %p8488_p7, %p8487_p1 }
 0x11b   : > { %p8485_p8 = pneg %p8484_p9  ;;  %p8491_p11 = por %p8490_p10, %p8489_p4 }
 0x11d   : > { %p8492_p12 = pnand %p8491_p11, %p8485_p8 }
 0x11f   : > { %8495 = shalt.err (!%p8492_p12)
}
 0x120   : > { %s8496_s18 = scalar_lea.vmem %s9183_s27, 384  ;;  %s8688_s14 = smov [#allocation8]  }
 0x121   : > { %p8497_p5 = scmp.ne.s32.totalorder %s9183_s27, %s8496_s18  ;;  %s8501_s10 = sshll.u32 %s8688_s14, 4  ;;  %s8502_s10 = int_to_ptr.vmem [resolvable:$false] %s8501_s10 }
 0x122   : > { %s8503_s5 = scalar_lea.vmem %s8502_s10, 768  ;;  %p8504_p9 = scmp.lt.s32.totalorder %s9183_s27, %s8502_s10 }
 0x123   : > { %p8499_p13 = pnand %p8497_p5, %p8483_p0  ;;  %p8505_p1 = scmp.lt.s32.totalorder %s8503_s5, %s8496_s18 }
 0x125   : > { %p8500_p3 = pneg %p8499_p13  ;;  %p8506_p7 = por %p8505_p1, %p8504_p9 }
 0x127   : > { %p8507_p4 = pnand %p8506_p7, %p8500_p3 }
 0x129   : > { %8510 = shalt.err (!%p8507_p4)
}
 0x12a   : > { %s8689_s7 = smov 256   ;;  %s10569_s26 = sld [smem:[#allocation32_spill]] }
 0x12b   : > { %8140 = dma.hbm_to_vmem [thread:$0]  (!%p10568_p2), %s9181_s9, 384, %s9183_s27, %s9187_s25, %s8689_s7, %s10549_s8, %s10548_s1  }
 0x130   : > { %p10570_p0 = scmp.ne.s32.totalorder %s10569_s26, 0 }
 0x131   : > { %s10571_s11 = sld [smem:[#allocation28_spill]] (!%p10570_p0) }
 0x132   : > { %492 = sbr.rel (%p10570_p0) target bundleno = 2069 (0x815), region = 64 }
 0x137   : > { %s494_s24 = sand.u32 (!%p10570_p0), 1, %s10571_s11  }
 0x138   : > { %s9220_s23 = sshll.u32 (!%p10570_p0), %s494_s24, 4  ;;  %s495_s16 = scalar_lea.sflag (!%p10570_p0), [#allocation3], %s494_s24 }
 0x139   : > { %s498_s22 = scalar_lea.vmem [#allocation2], %s9220_s23 }
 0x13a   : > { %8596 = dma.done.wait (%p9100_p6), %s495_s16, 256  }
 0x13b   : > { %8598 = vsyncadd (%p9100_p6), %s495_s16, 4294967040  ;;  %s503_s17 = sand.u32 1, %s8825_s12   ;;  %s505_s1 = sand.u32 1, %s8641_s21  }
 0x13c   : > { %s9231_s8 = sshll.u32 %s505_s1, 3  ;;  %s504_s9 = scalar_lea.sflag [#allocation6], %s503_s17 }
 0x13d   : > { %s507_s27 = scalar_lea.vmem [#allocation5], %s9231_s8  ;;  %p10572_p2 = scmp.ne.s32.totalorder %s10527_s13, 0 }
 0x13f   : > { %8600 = dma.done.wait (%p10572_p2), %s504_s9, 256  }
 0x140   : > { %8602 = vsyncadd (%p10572_p2), %s504_s9, 4294967040  ;;  %s10573_s25 = sld [smem:[#allocation24_spill]]  ;;  %s10574_s3 = sld [smem:[#allocation37_spill]] }
 0x141   : > { %s516_s18 = scalar_lea.vmem [#allocation7], %s9231_s8  ;;  %s522_s14 = scalar_lea.sflag [#allocation9], %s503_s17 }
 0x146   : > { %s523_s20 = sand.u32 1, %s10573_s25   ;;  %p10575_p6 = scmp.ne.s32.totalorder %s10574_s3, 0 }
 0x147   : > { %s8088_s15 = smul.u32 24, %s523_s20 }
 0x149   : > { %s9240_s10 = scalar_lea.vmem [#allocation8], %s8088_s15 }
 0x14a   : > { %8604 = dma.done.wait (%p10575_p6), %s522_s14, 384  }
 0x14b   : > { %8606 = vsyncadd (%p10575_p6), %s522_s14, 4294966912  ;;  %p10576_p8 = scmp.eq.s32.totalorder %s8825_s12, 0 }
 0x14d   : > { %8608 = dma.done.wait (%p10576_p8), [#allocation9], 1536   ;;  %p10577_p10 = pmov %p10576_p8 }
 0x14e   : > { %p10578_p11 = pmov %p10576_p8 }
 0x14f   : > { %8610 = vsyncadd (%p10577_p10), [#allocation9], 4294965760 }
 0x150   : > { %8612 = dma.done.wait (%p10578_p11), [#allocation12], 1536   ;;  %p10579_p12 = pmov %p10576_p8 }
 0x151   : > { %p10580_p5 = pmov %p10576_p8 }
 0x152   : > { %8614 = vsyncadd (%p10579_p12), [#allocation12], 4294965760 }
 0x153   : > { %8616 = dma.done.wait (%p10580_p5), [#allocation15], 2048   ;;  %p10581_p13 = pmov %p10580_p5 }
 0x154   : > { %v8690_v0 = vmov 0.0|0.0   ;;  %vm8691_vm0 = vmmov 0   ;;  %v8692_v1 = vmov 0.0   ;;  %v595_v2 = vld [vmem:[%s498_s22] sm:$0xff]  ;;  %v596_v3 = vld [vmem:[%s498_s22 + $0x8] sm:$0xff]  ;;  %vm600_vm1 = vcmask 130048  }
 0x155   : > { %8618 = vsyncadd (%p10581_p13), [#allocation15], 4294965248  ;;  %7445 = vmatprep.subr.bf16.mxu1 %v8690_v0  ;;  %7448 = vmatprep.subr.bf16.mxu0 %v8690_v0  ;;  %v9268_v4 = vld [vmem:[%s516_s18] sm:$0xff]  ;;  %v605_v5 = vand.u32 4294901760, %v595_v2  ;;  %v608_v6 = vand.u32 4294901760, %v596_v3  ;;  %v6078_v8 = vld [vmem:[%s9240_s10 + $0x8] sm:$0xff] }
 0x156   : > { %6525 = vmatprep.mubr.msk.f32.mxu1 %vm8691_vm0, %v8692_v1  ;;  %6532 = vmatprep.mubr.msk.f32.mxu0 %vm8691_vm0, %v8692_v1  ;;  %v598_v7 = vld [vmem:[%s9240_s10] sm:$0xff]  ;;  %v1069_v10 = vmul.f32 %v6078_v8, %v9268_v4  ;;  %v6079_v35 = vld [vmem:[%s9240_s10 + $0x10] sm:$0xff]  ;;  %vm1537_vm2 = vcmask 261120   ;;  %vm3975_vm3 = vcmask 523264   ;;  %s10582_s5 = sld [smem:[#allocation46_spill]]  ;;  %s10596_s26 = sld [smem:[#allocation30_spill]] }
 0x157   : > { %v599_v9 = vmul.f32 %v598_v7, %v9268_v4  ;;  %v9274_v11 = vpack.c.bf16 %v608_v6, %v605_v5  ;;  %v683_v12 = vsub.f32 %v595_v2, %v605_v5  ;;  %v690_v13 = vsub.f32 %v596_v3, %v608_v6  ;;  %v1533_v43 = vld [vmem:[#allocation10 + $0x20] sm:$0xff]  ;;  %v1534_v44 = vld [vmem:[#allocation10 + $0x28] sm:$0xff]  ;;  %v1535_v50 = vld [vmem:[#allocation10 + $0x30] sm:$0xff]  ;;  %s10595_s7 = sld [smem:[#allocation31_spill]]  ;;  %s10597_s23 = sld [smem:[#allocation38_spill]] }
 0x158   : > { %v1071_v15 = vsel %vm600_vm1, %v1069_v10, 0  ;;  %v2516_v36 = vmul.f32 %v6079_v35, %v9268_v4  ;;  %v1542_v45 = vand.u32 4294901760, %v1533_v43  ;;  %v1545_v46 = vand.u32 4294901760, %v1534_v44  ;;  %v1536_v51 = vld [vmem:[#allocation10 + $0x38] sm:$0xff]  ;;  %s10598_s17 = sld [smem:[#allocation47_spill]]  ;;  %s10599_s25 = sld [smem:[#allocation48_spill]] }
 0x159   : > { %v602_v14 = vsel %vm600_vm1, %v599_v9, 0  ;;  %7447 = vmatpush3.bf16.msra.mxu1 %v9274_v11  ;;  %v684_v16 = vand.u32 4294901760, %v683_v12  ;;  %v691_v17 = vand.u32 4294901760, %v690_v13  ;;  %v9279_v19 = vand.u32 4294901760, %v1071_v15  ;;  %s594_s20 = scalar_lea.vmem [#allocation16], %s9231_s8  ;;  %s10600_s10 = sld [smem:[#allocation50_spill]] }
 0x15a   : > { %v671_v18 = vand.u32 4294901760, %v602_v14  ;;  %7463 = vmatprep.subr.bf16.mxu1 %v8690_v0  ;;  %v7452_v32 = vpack.c.bf16 %v690_v13, %v683_v12  ;;  %v2518_v37 = vsel %vm600_vm1, %v2516_v36, 0  ;;  %v9355_v47 = vpack.c.bf16 %v1545_v46, %v1542_v45  ;;  %v3486_v36 = vld [vmem:[#allocation13 + $0x18] sm:$0xff]  ;;  %s5860_s15 = sshll.u32 %s594_s20, 4  ;;  %s5845_s13 = scalar_lea.sflag [#allocation4], %s505_s1  ;;  %s10360_s15 = int_to_ptr.vmem [resolvable:$true] %s5860_s15 }
 0x15b   : > { %v685_v20 = vsub.f32 %v683_v12, %v684_v16  ;;  %v692_v21 = vsub.f32 %v690_v13, %v691_v17  ;;  %v1141_v23 = vsub.f32 %v1071_v15, %v9279_v19  ;;  %v7458_v34 = vpack.c.bf16 %v691_v17, %v684_v16  ;;  %s8693_s8 = smov [#allocation16]  }
 0x15c   : > { %v672_v22 = vsub.f32 %v602_v14, %v671_v18  ;;  %v2587_v38 = vand.u32 4294901760, %v2518_v37  ;;  %v1622_v48 = vsub.f32 %v1533_v43, %v1542_v45  ;;  %v1629_v49 = vsub.f32 %v1534_v44, %v1545_v46 }
 0x15d   : > { %v686_v24 = vand.u32 4294901760, %v685_v20  ;;  %v693_v25 = vand.u32 4294901760, %v692_v21  ;;  %v1142_v27 = vand.u32 4294901760, %v1141_v23  ;;  %v1548_v52 = vand.u32 4294901760, %v1535_v50  ;;  %s6084_s11 = sshll.u32 %s10595_s7, 1  ;;  %p10601_p9 = scmp.ne.s32.totalorder %s10597_s23, 0 }
 0x15e   : > { %v673_v26 = vand.u32 4294901760, %v672_v22  ;;  %v2588_v39 = vsub.f32 %v2518_v37, %v2587_v38  ;;  %v1551_v53 = vand.u32 4294901760, %v1536_v51  ;;  %v1623_v54 = vand.u32 4294901760, %v1622_v48  ;;  %s5856_s24 = sadd.s32 %s10596_s26, %s6084_s11  ;;  %s8515_s7 = sshll.u32 %s8693_s8, 4  ;;  %s8516_s7 = int_to_ptr.vmem [resolvable:$false] %s8515_s7 }
 0x15f   : > { %v9283_v28 = vpack.c.bf16 %v693_v25, %v686_v24  ;;  %v1143_v30 = vsub.f32 %v1141_v23, %v1142_v27  ;;  %v1630_v55 = vand.u32 4294901760, %v1629_v49  ;;  %v9361_v57 = vsub.f32 %v1535_v50, %v1548_v52  ;;  %s6085_s3 = sshll.u32 %s5856_s24, 7  ;;  %s8517_s26 = scalar_lea.vmem %s8516_s7, 256 }
 0x160   : > { %v674_v29 = vsub.f32 %v672_v22, %v673_v26  ;;  %v2589_v40 = vand.u32 4294901760, %v2588_v39  ;;  %v9359_v56 = vpack.c.bf16 %v1551_v53, %v1548_v52  ;;  %v9363_v58 = vsub.f32 %v1536_v51, %v1551_v53  ;;  %v9429_v53 = vld [vmem:[#allocation11 + $0x10] sm:$0xff]  ;;  %s10358_s12 = scalar_lea.hbm %s10600_s10, %s6085_s3  ;;  %p8518_p4 = scmp.lt.s32.totalorder %s10360_s15, %s8516_s7 }
 0x161   : > { %7450 = vmatpush3.bf16.msra.mxu0 %v9283_v28  ;;  %v1144_v33 = vand.u32 4294901760, %v1143_v30  ;;  %v1624_v59 = vsub.f32 %v1622_v48, %v1623_v54  ;;  %v1631_v60 = vsub.f32 %v1629_v49, %v1630_v55  ;;  %v1637_v62 = vand.u32 4294901760, %v9361_v57  ;;  %v3483_v30 = vld [vmem:[#allocation13] sm:$0xff] }
 0x162   : > { %v675_v31 = vand.u32 4294901760, %v674_v29  ;;  %7451 = vmatprep.subr.bf16.mxu0 %v8690_v0  ;;  %v2590_v41 = vsub.f32 %v2588_v39, %v2589_v40  ;;  %v1644_v63 = vand.u32 4294901760, %v9363_v58  ;;  %v7494_v9 = vpack.c.bf16 %v1629_v49, %v1622_v48 }
 0x163   : > { %v1625_v61 = vand.u32 4294901760, %v1624_v59  ;;  %v1632_v2 = vand.u32 4294901760, %v1631_v60  ;;  %v1638_v3 = vsub.f32 %v9361_v57, %v1637_v62  ;;  %v7497_v10 = vpack.c.bf16 %v9363_v58, %v9361_v57  ;;  %v9448_v60 = vld [vmem:[#allocation11 + $0x20] sm:$0xff] }
 0x164   : > { %6526 = vmatmul.mubr.f32.vlgmr.msra.gmra.mrb[0].mxu1 %v675_v31  ;;  %6533 = vmatmul.mubr.f32.vlgmr.msra.gmra.mrb[0].mxu0 %v671_v18  ;;  %v2591_v42 = vand.u32 4294901760, %v2590_v41  ;;  %v1645_v4 = vsub.f32 %v9363_v58, %v1644_v63  ;;  %v9375_v12 = vpack.c.bf16 %v1644_v63, %v1637_v62  ;;  %v3484_v31 = vld [vmem:[#allocation13 + $0x8] sm:$0xff] }
 0x165   : > { %7465 = vmatpush3.bf16.msra.mxu1 %v9274_v11  ;;  %6567 = vmatprep.mubr.msk.f32.mxu1 %vm8691_vm0, %v8692_v1  ;;  %v7488_v5 = vpack.c.bf16 %v1632_v2, %v1625_v61  ;;  %v1639_v6 = vand.u32 4294901760, %v1638_v3  ;;  %v3494_v35 = vand.u32 4294901760, %v3484_v31  ;;  %v3986_v3 = vand.u32 4294901760, %v9429_v53 }
 0x166   : > { %7466 = vmatprep.subr.bf16.mxu1 %v8690_v0  ;;  %7453 = vmatpush3.bf16.msra.mxu0 %v7452_v32  ;;  %v1646_v7 = vand.u32 4294901760, %v1645_v4 }
 0x167   : > { %6539 = vmatprep.mubr.msk.f32.mxu0 %vm8691_vm0, %v8692_v1  ;;  %7454 = vmatprep.subr.bf16.mxu0 %v8690_v0  ;;  %v9414_v43 = vsub.f32 %v3484_v31, %v3494_v35  ;;  %v1065_v31 = vld [vmem:[#allocation10 + $0x10] sm:$0xff] }
 0x168   : > { %6568 = vmatmul.mubr.f32.vlgmr.msra.gmra.mrb[2].mxu1 %v1144_v33  ;;  %v7491_v8 = vpack.c.bf16 %v1646_v7, %v1639_v6 }
 0x169   : > { %7468 = vmatpush3.bf16.msra.mxu1 %v9283_v28  ;;  %6574 = vmatprep.mubr.msk.f32.mxu1 %vm8691_vm0, %v8692_v1  ;;  %v3579_v51 = vand.u32 4294901760, %v9414_v43 }
 0x16a   : > { %7469 = vmatprep.subr.bf16.mxu1 %v8690_v0 }
 0x16b   : > { %v3580_v62 = vsub.f32 %v9414_v43, %v3579_v51 }
 0x16c   : > { %6540 = vmatmul.mubr.f32.vlgmr.msra.gmra.mrb[0].mxu0 %v672_v22 }
 0x16d   : > { %7456 = vmatpush3.bf16.msra.mxu0 %v9274_v11  ;;  %6546 = vmatprep.mubr.msk.f32.mxu0 %vm8691_vm0, %v8692_v1 }
 0x16e   : > { %7457 = vmatprep.subr.bf16.mxu0 %v8690_v0 }
 0x170   : > { %6575 = vmatmul.mubr.f32.vlgmr.msra.gmra.mrb[2].mxu1 %v9279_v19 }
 0x171   : > { %7471 = vmatpush3.bf16.msra.mxu1 %v7452_v32  ;;  %6581 = vmatprep.mubr.msk.f32.mxu1 %vm8691_vm0, %v8692_v1 }
 0x172   : > { %7472 = vmatprep.subr.bf16.mxu1 %v8690_v0 }
 0x174   : > { %6547 = vmatmul.mubr.f32.vlgmr.msra.gmra.mrb[0].mxu0 %v673_v26 }
 0x175   : > { %7459 = vmatpush3.bf16.msra.mxu0 %v7458_v34  ;;  %6553 = vmatprep.mubr.msk.f32.mxu0 %vm8691_vm0, %v8692_v1 }
 0x176   : > { %7460 = vmatprep.subr.bf16.mxu0 %v8690_v0 }
 0x178   : > { %6582 = vmatmul.mubr.f32.vlgmr.msra.gmra.mrb[2].mxu1 %v1141_v23  ;;  %v3482_v23 = vld [vmem:[%s507_s27] sm:$0xff] }
 0x179   : > { %7474 = vmatpush3.bf16.msra.mxu1 %v9274_v11  ;;  %6588 = vmatprep.mubr.msk.f32.mxu1 %vm8691_vm0, %v8692_v1  ;;  %v3488_v26 = vsel %vm1537_vm2, %v3482_v23, 0  ;;  %v1063_v23 = vld [vmem:[#allocation10] sm:$0xff] }
 0x17a   : > { %7475 = vmatprep.subr.bf16.mxu1 %v8690_v0 }
 0x17c   : > { %6554 = vmatmul.mubr.f32.vlgmr.msra.gmra.mrb[0].mxu0 %v671_v18 }
 0x17d   : > { %7462 = vmatpush3.bf16.msra.mxu0 %v9274_v11  ;;  %6560 = vmatprep.mubr.msk.f32.mxu0 %vm8691_vm0, %v8692_v1 }
 0x17e   : > { %7481 = vmatprep.subr.bf16.mxu0 %v8690_v0 }
 0x180   : > { %6589 = vmatmul.mubr.f32.vlgmr.msra.gmra.mrb[2].mxu1 %v1142_v27 }
 0x181   : > { %7477 = vmatpush3.bf16.msra.mxu1 %v7458_v34  ;;  %6595 = vmatprep.mubr.msk.f32.mxu1 %vm8691_vm0, %v8692_v1 }
 0x182   : > { %7478 = vmatprep.subr.bf16.mxu1 %v8690_v0 }
 0x184   : > { %6561 = vmatmul.mubr.f32.vlgmr.msra.gmra.mrb[0].mxu0 %v671_v18 }
 0x185   : > { %6613 = vmatprep.mubr.msk.f32.mxu0 %vm8691_vm0, %v8692_v1  ;;  %7483 = vmatpush3.bf16.msra.mxu0 %v9355_v47 }
 0x186   : > { %7484 = vmatprep.subr.bf16.mxu0 %v8690_v0 }
 0x188   : > { %6596 = vmatmul.mubr.f32.vlgmr.msra.gmra.mrb[2].mxu1 %v9279_v19 }
 0x189   : > { %7480 = vmatpush3.bf16.msra.mxu1 %v9274_v11  ;;  %6602 = vmatprep.mubr.msk.f32.mxu1 %vm8691_vm0, %v8692_v1 }
 0x18a   : > { %7553 = vmatprep.subr.bf16.mxu1 %v8690_v0  ;;  %7486 = vmatpush3.bf16.msra.mxu0 %v9359_v56 }
 0x18b   : > { %7487 = vmatprep.subr.bf16.mxu0 %v8690_v0 }
 0x190   : > { %6603 = vmatmul.mubr.f32.vlgmr.msra.gmra.mrb[2].mxu1 %v9279_v19 }
 0x191   : > { %7555 = vmatpush3.bf16.msra.mxu1 %v9274_v11  ;;  %6741 = vmatprep.mubr.msk.f32.mxu1 %vm8691_vm0, %v8692_v1 }
 0x192   : > { %7556 = vmatprep.subr.bf16.mxu1 %v8690_v0 }
 0x194   : > { %6742 = vmatmul.mubr.f32.vlgmr.msra.gmra.mrb[4].mxu1 %v2591_v42 }
 0x195   : > { %7558 = vmatpush3.bf16.msra.mxu1 %v9283_v28  ;;  %6748 = vmatprep.mubr.msk.f32.mxu1 %vm8691_vm0, %v8692_v1  ;;  %v9392_v28 = vand.u32 4294901760, %v3488_v26 }
 0x196   : > { %7559 = vmatprep.subr.bf16.mxu1 %v8690_v0 }
 0x197   : > { %v9398_v29 = vsub.f32 %v3488_v26, %v9392_v28 }
 0x199   : > { %v3561_v33 = vand.u32 4294901760, %v9398_v29 }
 0x19b   : > { %v3562_v49 = vsub.f32 %v9398_v29, %v3561_v33 }
 0x19c   : > { %6749 = vmatmul.mubr.f32.vlgmr.msra.gmra.mrb[4].mxu1 %v2587_v38 }
 0x19d   : > { %7561 = vmatpush3.bf16.msra.mxu1 %v7452_v32  ;;  %6755 = vmatprep.mubr.msk.f32.mxu1 %vm8691_vm0, %v8692_v1  ;;  %v3485_v32 = vld [vmem:[#allocation13 + $0x10] sm:$0xff]  ;;  %v3563_v6 = vand.u32 4294901760, %v3562_v49 }
 0x19e   : > { %7562 = vmatprep.subr.bf16.mxu1 %v8690_v0  ;;  %v3497_v37 = vand.u32 4294901760, %v3485_v32 }
 0x1a0   : > { %v9416_v44 = vsub.f32 %v3485_v32, %v3497_v37  ;;  %v1066_v32 = vld [vmem:[#allocation10 + $0x18] sm:$0xff] }
 0x1a2   : > { %v3586_v52 = vand.u32 4294901760, %v9416_v44 }
 0x1a4   : > { %6756 = vmatmul.mubr.f32.vlgmr.msra.gmra.mrb[4].mxu1 %v2588_v39  ;;  %v9407_v39 = vld [vmem:[#allocation11 + $0x8] sm:$0xff]  ;;  %v3587_v63 = vsub.f32 %v9416_v44, %v3586_v52 }
 0x1a5   : > { %7564 = vmatpush3.bf16.msra.mxu1 %v9274_v11  ;;  %6762 = vmatprep.mubr.msk.f32.mxu1 %vm8691_vm0, %v8692_v1  ;;  %v3983_v48 = vand.u32 4294901760, %v9407_v39 }
 0x1a6   : > { %7565 = vmatprep.subr.bf16.mxu1 %v8690_v0 }
 0x1a7   : > { %v9446_v59 = vsub.f32 %v9407_v39, %v3983_v48 }
 0x1ac   : > { %6763 = vmatmul.mubr.f32.vlgmr.msra.gmra.mrb[4].mxu1 %v2589_v40  ;;  %v3500_v40 = vand.u32 4294901760, %v3486_v36 }
 0x1ad   : > { %7567 = vmatpush3.bf16.msra.mxu1 %v7458_v34  ;;  %6769 = vmatprep.mubr.msk.f32.mxu1 %vm8691_vm0, %v8692_v1  ;;  %v3491_v34 = vand.u32 4294901760, %v3483_v30 }
 0x1ae   : > { %7568 = vmatprep.subr.bf16.mxu1 %v8690_v0  ;;  %v9418_v45 = vsub.f32 %v3486_v36, %v3500_v40  ;;  %v2039_v36 = vand.u32 4294901760, %v1066_v32 }
 0x1af   : > { %v9410_v41 = vpack.c.bf16 %v3494_v35, %v3491_v34  ;;  %v9412_v42 = vsub.f32 %v3483_v30, %v3491_v34 }
 0x1b0   : > { %v3593_v57 = vand.u32 4294901760, %v9418_v45  ;;  %v9533_v49 = vsub.f32 %v1066_v32, %v2039_v36 }
 0x1b1   : > { %v3572_v50 = vand.u32 4294901760, %v9412_v42  ;;  %v7620_v34 = vpack.c.bf16 %v9414_v43, %v9412_v42 }
 0x1b2   : > { %v3594_v2 = vsub.f32 %v9418_v45, %v3593_v57 }
 0x1b3   : > { %v3573_v61 = vsub.f32 %v9412_v42, %v3572_v50  ;;  %v7635_v42 = vpack.c.bf16 %v3593_v57, %v3586_v52  ;;  %v2983_v52 = vld [vmem:[#allocation10 + $0x58] sm:$0xff] }
 0x1b4   : > { %6770 = vmatmul.mubr.f32.vlgmr.msra.gmra.mrb[4].mxu1 %v2587_v38 }
 0x1b5   : > { %7570 = vmatpush3.bf16.msra.mxu1 %v9274_v11  ;;  %6776 = vmatprep.mubr.msk.f32.mxu1 %vm8691_vm0, %v8692_v1  ;;  %v9373_v11 = vpack.c.bf16 %v1630_v55, %v1623_v54  ;;  %v9431_v54 = vld [vmem:[#allocation11 + $0x18] sm:$0xff]  ;;  %v9435_v55 = vpack.c.bf16 %v3500_v40, %v3497_v37  ;;  %v3574_v7 = vand.u32 4294901760, %v3573_v61 }
 0x1b6   : > { %7607 = vmatprep.subr.bf16.mxu1 %v8690_v0  ;;  %v3989_v4 = vand.u32 4294901760, %v9431_v54 }
 0x1bc   : > { %6777 = vmatmul.mubr.f32.vlgmr.msra.gmra.mrb[4].mxu1 %v2587_v38  ;;  %v9405_v38 = vld [vmem:[#allocation11] sm:$0xff] }
 0x1bd   : > { %6853 = vmatprep.mubr.msk.f32.mxu1 %vm8691_vm0, %v8692_v1  ;;  %v3980_v46 = vand.u32 4294901760, %v9405_v38  ;;  %7609 = vmatpush3.bf16.msra.mxu1 %v9410_v41 }
 0x1be   : > { %7610 = vmatprep.subr.bf16.mxu1 %v8690_v0 }
 0x1bf   : > { %v9441_v58 = vsub.f32 %v9405_v38, %v3980_v46  ;;  %v9630_v38 = vpack.c.bf16 %v3989_v4, %v3986_v3 }
 0x1c1   : > { %7612 = vmatpush3.bf16.msra.mxu1 %v9435_v55 }
 0x1c2   : > { %7613 = vmatprep.subr.bf16.mxu1 %v8690_v0 }
 0x1c4   : > { %6854 = vmatmul.mubr.f32.vlgmr.msra.gmra.mrb[6].mxu1 %v3563_v6 }
 0x1c5   : > { %6864 = vmatprep.mubr.msk.f32.mxu1 %vm8691_vm0, %v8692_v1 }
 0x237   : > { %v677_v13 = vpop.f32.mrb[0].mxu1 }
 0x238   : > { %v6527_v14 = vpop.f32.mrb[1].mxu1 }
 0x239   : > { %v9476_v14 = vsub.f32 %v9429_v53, %v3986_v3 }
 0x257   : > { %v1059_v15 = vpop.f32.mrb[0].mxu0 }
 0x258   : > { %v9377_v16 = vadd.f32 %v1059_v15, %v677_v13  ;;  %v6562_v17 = vpop.f32.mrb[1].mxu0  ;;  %v3595_v13 = vand.u32 4294901760, %v3594_v2  ;;  %v9481_v15 = vsub.f32 %v9431_v54, %v3989_v4 }
 0x25a   : > { %v2027_v35 = vsel %vm1537_vm2, %v9377_v16, 0  ;;  %v7623_v16 = vpack.c.bf16 %v9418_v45, %v9416_v44  ;;  %v2980_v44 = vld [vmem:[#allocation10 + $0x40] sm:$0xff]  ;;  %v2981_v45 = vld [vmem:[#allocation10 + $0x48] sm:$0xff] }
 0x25b   : > { %v9517_v37 = vand.u32 4294901760, %v2027_v35 }
 0x25d   : > { %v9538_v2 = vsub.f32 %v2027_v35, %v9517_v37 }
 0x263   : > { %v1528_v18 = vpop.f32.mrb[2].mxu1 }
 0x264   : > { %v1539_v19 = vsel %vm1537_vm2, %v1528_v18, 0  ;;  %v6604_v20 = vpop.f32.mrb[3].mxu1 }
 0x265   : > { %v9380_v21 = vand.u32 4294901760, %v1539_v19 }
 0x267   : > { %v9383_v22 = vsub.f32 %v1539_v19, %v9380_v21 }
 0x269   : > { %v1612_v24 = vand.u32 4294901760, %v9383_v22 }
 0x26b   : > { %v1613_v25 = vsub.f32 %v9383_v22, %v1612_v24 }
 0x26d   : > { %v1614_v27 = vand.u32 4294901760, %v1613_v25  ;;  %v1064_v25 = vld [vmem:[#allocation10 + $0x8] sm:$0xff] }
 0x26e   : > { %v2033_v30 = vand.u32 4294901760, %v1064_v25 }
 0x26f   : > { %6614 = vmatmul.mubr.f32.vlgmr.msra.gmra.mrb[2].mxu0 %v1614_v27  ;;  %v2030_v27 = vand.u32 4294901760, %v1063_v23 }
 0x270   : > { %7489 = vmatpush3.bf16.msra.mxu0 %v7488_v5  ;;  %6624 = vmatprep.mubr.msk.f32.mxu0 %vm8691_vm0, %v8692_v1  ;;  %v9465_v5 = vld [vmem:[#allocation11 + $0x28] sm:$0xff] }
 0x271   : > { %7490 = vmatprep.subr.bf16.mxu0 %v8690_v0  ;;  %v3995_v18 = vand.u32 4294901760, %v9465_v5 }
 0x273   : > { %v9494_v20 = vsub.f32 %v9465_v5, %v3995_v18 }
 0x274   : > { %7492 = vmatpush3.bf16.msra.mxu0 %v7491_v8  ;;  %v3581_v8 = vand.u32 4294901760, %v3580_v62 }
 0x275   : > { %7493 = vmatprep.subr.bf16.mxu0 %v8690_v0 }
 0x276   : > { %v7614_v17 = vpack.c.bf16 %v3581_v8, %v3574_v7 }
 0x277   : > { %6625 = vmatmul.mubr.f32.vlgmr.msra.gmra.mrb[2].mxu0 %v9380_v21 }
 0x278   : > { %7495 = vmatpush3.bf16.msra.mxu0 %v7494_v9  ;;  %6635 = vmatprep.mubr.msk.f32.mxu0 %vm8691_vm0, %v8692_v1  ;;  %v3992_v9 = vand.u32 4294901760, %v9448_v60 }
 0x279   : > { %7496 = vmatprep.subr.bf16.mxu0 %v8690_v0  ;;  %7615 = vmatpush3.bf16.msra.mxu1 %v7614_v17 }
 0x27a   : > { %v9488_v19 = vsub.f32 %v9448_v60, %v3992_v9  ;;  %7616 = vmatprep.subr.bf16.mxu1 %v8690_v0  ;;  %v2997_v60 = vand.u32 4294901760, %v2983_v52 }
 0x27c   : > { %7498 = vmatpush3.bf16.msra.mxu0 %v7497_v10  ;;  %v3588_v10 = vand.u32 4294901760, %v3587_v63  ;;  %v3089_v5 = vsub.f32 %v2983_v52, %v2997_v60  ;;  %v4093_v52 = vand.u32 4294901760, %v9488_v19 }
 0x27d   : > { %7499 = vmatprep.subr.bf16.mxu0 %v8690_v0 }
 0x27e   : > { %v7617_v26 = vpack.c.bf16 %v3595_v13, %v3588_v10  ;;  %v2132_v10 = vand.u32 4294901760, %v9533_v49  ;;  %v2100_v13 = vand.u32 4294901760, %v9538_v2 }
 0x27f   : > { %6636 = vmatmul.mubr.f32.vlgmr.msra.gmra.mrb[2].mxu0 %v9383_v22  ;;  %v9514_v22 = vsub.f32 %v1064_v25, %v2033_v30 }
 0x280   : > { %7501 = vmatpush3.bf16.msra.mxu0 %v9355_v47  ;;  %6646 = vmatprep.mubr.msk.f32.mxu0 %vm8691_vm0, %v8692_v1 }
 0x281   : > { %7502 = vmatprep.subr.bf16.mxu0 %v8690_v0  ;;  %7618 = vmatpush3.bf16.msra.mxu1 %v7617_v26  ;;  %v2118_v63 = vand.u32 4294901760, %v9514_v22  ;;  %v2133_v26 = vsub.f32 %v9533_v49, %v2132_v10 }
 0x282   : > { %7619 = vmatprep.subr.bf16.mxu1 %v8690_v0 }
 0x283   : > { %v2119_v7 = vsub.f32 %v9514_v22, %v2118_v63  ;;  %v2134_v32 = vand.u32 4294901760, %v2133_v26 }
 0x284   : > { %7504 = vmatpush3.bf16.msra.mxu0 %v9359_v56  ;;  %6865 = vmatmul.mubr.f32.vlgmr.msra.gmra.mrb[8].mxu1 %v9392_v28 }
 0x285   : > { %7505 = vmatprep.subr.bf16.mxu0 %v8690_v0  ;;  %7621 = vmatpush3.bf16.msra.mxu1 %v7620_v34 }
 0x286   : > { %7622 = vmatprep.subr.bf16.mxu1 %v8690_v0  ;;  %6875 = vmatprep.mubr.msk.f32.mxu1 %vm8691_vm0, %v8692_v1 }
 0x287   : > { %6647 = vmatmul.mubr.f32.vlgmr.msra.gmra.mrb[2].mxu0 %v1612_v24  ;;  %v2036_v24 = vand.u32 4294901760, %v1065_v31 }
 0x288   : > { %7507 = vmatpush3.bf16.msra.mxu0 %v9373_v11  ;;  %6657 = vmatprep.mubr.msk.f32.mxu0 %vm8691_vm0, %v8692_v1  ;;  %v9512_v11 = vsub.f32 %v1063_v23, %v2030_v27  ;;  %v2120_v23 = vand.u32 4294901760, %v2119_v7 }
 0x289   : > { %7508 = vmatprep.subr.bf16.mxu0 %v8690_v0  ;;  %v9531_v40 = vsub.f32 %v1065_v31, %v2036_v24  ;;  %7624 = vmatpush3.bf16.msra.mxu1 %v7623_v16  ;;  %v3090_v16 = vand.u32 4294901760, %v3089_v5 }
 0x28a   : > { %v2111_v62 = vand.u32 4294901760, %v9512_v11  ;;  %7625 = vmatprep.subr.bf16.mxu1 %v8690_v0 }
 0x28b   : > { %v2125_v8 = vand.u32 4294901760, %v9531_v40 }
 0x28c   : > { %7510 = vmatpush3.bf16.msra.mxu0 %v9375_v12  ;;  %v2112_v6 = vsub.f32 %v9512_v11, %v2111_v62  ;;  %6876 = vmatmul.mubr.f32.vlgmr.msra.gmra.mrb[10].mxu1 %v9398_v29  ;;  %v7530_v29 = vpack.c.bf16 %v9514_v22, %v9512_v11  ;;  %v7542_v39 = vpack.c.bf16 %v2118_v63, %v2111_v62 }
 0x28d   : > { %7511 = vmatprep.subr.bf16.mxu0 %v8690_v0  ;;  %7627 = vmatpush3.bf16.msra.mxu1 %v9410_v41  ;;  %v2126_v25 = vsub.f32 %v9531_v40, %v2125_v8  ;;  %v3091_v63 = vsub.f32 %v3089_v5, %v3090_v16 }
 0x28e   : > { %7628 = vmatprep.subr.bf16.mxu1 %v8690_v0  ;;  %6886 = vmatprep.mubr.msk.f32.mxu1 %vm8691_vm0, %v8692_v1  ;;  %v2113_v17 = vand.u32 4294901760, %v2112_v6 }
 0x28f   : > { %6658 = vmatmul.mubr.f32.vlgmr.msra.gmra.mrb[2].mxu0 %v9380_v21  ;;  %v9526_v12 = vpop.f32.mrb[4].mxu1  ;;  %v2127_v31 = vand.u32 4294901760, %v2126_v25  ;;  %v3092_v7 = vand.u32 4294901760, %v3091_v63  ;;  %v3481_v25 = vld [vmem:[#allocation11 + $0x38] sm:$0xff] }
 0x290   : > { %7513 = vmatpush3.bf16.msra.mxu0 %v9355_v47  ;;  %6668 = vmatprep.mubr.msk.f32.mxu0 %vm8691_vm0, %v8692_v1  ;;  %v6778_v61 = vpop.f32.mrb[5].mxu1  ;;  %v9542_v47 = vpack.c.bf16 %v2033_v30, %v2030_v27  ;;  %v7632_v27 = vpack.c.bf16 %v3579_v51, %v3572_v50  ;;  %v7524_v30 = vpack.c.bf16 %v2120_v23, %v2113_v17  ;;  %v2991_v50 = vand.u32 4294901760, %v2981_v45  ;;  %v2982_v51 = vld [vmem:[#allocation10 + $0x50] sm:$0xff] }
 0x291   : > { %7514 = vmatprep.subr.bf16.mxu0 %v8690_v0  ;;  %7630 = vmatpush3.bf16.msra.mxu1 %v9435_v55  ;;  %v7527_v43 = vpack.c.bf16 %v2134_v32, %v2127_v31  ;;  %v2985_v53 = vsel %vm1537_vm2, %v9526_v12, 0  ;;  %v2994_v57 = vand.u32 4294901760, %v2982_v51  ;;  %v3480_v23 = vld [vmem:[#allocation11 + $0x30] sm:$0xff]  ;;  %v4072_v31 = vand.u32 4294901760, %v9446_v59 }
 0x292   : > { %7631 = vmatprep.subr.bf16.mxu1 %v8690_v0  ;;  %v9663_v3 = vand.u32 4294901760, %v2985_v53  ;;  %v3998_v26 = vand.u32 4294901760, %v3480_v23 }
 0x293   : > { %v3082_v4 = vsub.f32 %v2982_v51, %v2994_v57 }
 0x294   : > { %7516 = vmatpush3.bf16.msra.mxu0 %v9359_v56  ;;  %v9561_v56 = vpack.c.bf16 %v2039_v36, %v2036_v24  ;;  %6887 = vmatmul.mubr.f32.vlgmr.msra.gmra.mrb[12].mxu1 %v3561_v33  ;;  %v7533_v33 = vpack.c.bf16 %v9533_v49, %v9531_v40  ;;  %v3057_v35 = vsub.f32 %v2985_v53, %v9663_v3  ;;  %v4100_v53 = vand.u32 4294901760, %v9494_v20 }
 0x295   : > { %7517 = vmatprep.subr.bf16.mxu0 %v8690_v0  ;;  %7633 = vmatpush3.bf16.msra.mxu1 %v7632_v27  ;;  %v3083_v36 = vand.u32 4294901760, %v3082_v4  ;;  %v7575_v40 = vpack.c.bf16 %v2997_v60, %v2994_v57  ;;  %v9718_v32 = vsub.f32 %v3480_v23, %v3998_v26 }
 0x296   : > { %7634 = vmatprep.subr.bf16.mxu1 %v8690_v0  ;;  %6897 = vmatprep.mubr.msk.f32.mxu1 %vm8691_vm0, %v8692_v1  ;;  %v3058_v12 = vand.u32 4294901760, %v3057_v35  ;;  %v4101_v57 = vsub.f32 %v9494_v20, %v4100_v53 }
 0x297   : > { %6669 = vmatmul.mubr.f32.vlgmr.msra.gmra.mrb[2].mxu0 %v9380_v21  ;;  %v2101_v21 = vsub.f32 %v9538_v2, %v2100_v13  ;;  %v3084_v62 = vsub.f32 %v3082_v4, %v3083_v36  ;;  %v7599_v17 = vpack.c.bf16 %v3090_v16, %v3083_v36  ;;  %v7668_v36 = vpack.c.bf16 %v9446_v59, %v9441_v58 }
 0x298   : > { %7519 = vmatpush3.bf16.msra.mxu0 %v9542_v47  ;;  %6679 = vmatprep.mubr.msk.f32.mxu0 %vm8691_vm0, %v8692_v1  ;;  %v7671_v16 = vpack.c.bf16 %v9481_v15, %v9476_v14 }
 0x299   : > { %7520 = vmatprep.subr.bf16.mxu0 %v8690_v0  ;;  %v2102_v34 = vand.u32 4294901760, %v2101_v21  ;;  %7636 = vmatpush3.bf16.msra.mxu1 %v7635_v42  ;;  %v3085_v6 = vand.u32 4294901760, %v3084_v62  ;;  %v4001_v21 = vand.u32 4294901760, %v3481_v25  ;;  %v9748_v62 = vpack.c.bf16 %v4100_v53, %v4093_v52  ;;  %v9813_v53 = vld [vmem:[#allocation14 + $0x30] sm:$0xff] }
 0x29a   : > { %7637 = vmatprep.subr.bf16.mxu1 %v8690_v0 }
 0x29b   : > { %v9710_v27 = vpack.c.bf16 %v4001_v21, %v3998_v26 }
 0x29c   : > { %7522 = vmatpush3.bf16.msra.mxu0 %v9561_v56  ;;  %6898 = vmatmul.mubr.f32.vlgmr.msra.gmra.mrb[14].mxu1 %v9392_v28 }
 0x29d   : > { %7523 = vmatprep.subr.bf16.mxu0 %v8690_v0  ;;  %7639 = vmatpush3.bf16.msra.mxu1 %v9410_v41  ;;  %v9617_v41 = vpack.c.bf16 %v3983_v48, %v3980_v46  ;;  %v7545_v46 = vpack.c.bf16 %v2132_v10, %v2125_v8  ;;  %v2988_v48 = vand.u32 4294901760, %v2980_v44 }
 0x29e   : > { %7640 = vmatprep.subr.bf16.mxu1 %v8690_v0  ;;  %6908 = vmatprep.mubr.msk.f32.mxu1 %vm8691_vm0, %v8692_v1 }
 0x29f   : > { %6680 = vmatmul.mubr.f32.vlgmr.msra.gmra.mrb[2].mxu0 %v2102_v34  ;;  %v3068_v54 = vsub.f32 %v2980_v44, %v2988_v48  ;;  %v7572_v11 = vpack.c.bf16 %v2991_v50, %v2988_v48  ;;  %v9720_v34 = vsub.f32 %v3481_v25, %v4001_v21  ;;  %v4086_v44 = vand.u32 4294901760, %v9481_v15 }
 0x2a0   : > { %7525 = vmatpush3.bf16.msra.mxu0 %v7524_v30  ;;  %6690 = vmatprep.mubr.msk.f32.mxu0 %vm8691_vm0, %v8692_v1  ;;  %v4065_v30 = vand.u32 4294901760, %v9441_v58 }
 0x2a1   : > { %7526 = vmatprep.subr.bf16.mxu0 %v8690_v0  ;;  %7642 = vmatpush3.bf16.msra.mxu1 %v9435_v55  ;;  %v3075_v55 = vsub.f32 %v2981_v45, %v2991_v50  ;;  %v4087_v48 = vsub.f32 %v9481_v15, %v4086_v44 }
 0x2a2   : > { %7643 = vmatprep.subr.bf16.mxu1 %v8690_v0  ;;  %v4066_v42 = vsub.f32 %v9441_v58, %v4065_v30 }
 0x2a3   : > { %v7584_v10 = vpack.c.bf16 %v3075_v55, %v3068_v54  ;;  %v4088_v51 = vand.u32 4294901760, %v4087_v48  ;;  %v9800_v48 = vld [vmem:[#allocation14 + $0x28] sm:$0xff] }
 0x2a4   : > { %7528 = vmatpush3.bf16.msra.mxu0 %v7527_v43  ;;  %6909 = vmatmul.mubr.f32.vlgmr.msra.gmra.mrb[16].mxu1 %v9392_v28  ;;  %v9642_v28 = vpack.c.bf16 %v3995_v18, %v3992_v9  ;;  %v3069_v9 = vand.u32 4294901760, %v3068_v54  ;;  %v3076_v18 = vand.u32 4294901760, %v3075_v55  ;;  %v4073_v43 = vsub.f32 %v9446_v59, %v4072_v31 }
 0x2a5   : > { %7529 = vmatprep.subr.bf16.mxu0 %v8690_v0  ;;  %7645 = vmatpush3.bf16.msra.mxu1 %v9617_v41 }
 0x2a6   : > { %7646 = vmatprep.subr.bf16.mxu1 %v8690_v0  ;;  %6927 = vmatprep.mubr.msk.f32.mxu1 %vm8691_vm0, %v8692_v1  ;;  %v3070_v22 = vsub.f32 %v3068_v54, %v3069_v9  ;;  %v3077_v24 = vsub.f32 %v3075_v55, %v3076_v18  ;;  %v4094_v55 = vsub.f32 %v9488_v19, %v4093_v52 }
 0x2a7   : > { %6691 = vmatmul.mubr.f32.vlgmr.msra.gmra.mrb[2].mxu0 %v9517_v37 }
 0x2a8   : > { %7531 = vmatpush3.bf16.msra.mxu0 %v7530_v29  ;;  %6701 = vmatprep.mubr.msk.f32.mxu0 %vm8691_vm0, %v8692_v1  ;;  %v3071_v49 = vand.u32 4294901760, %v3070_v22  ;;  %v3078_v61 = vand.u32 4294901760, %v3077_v24  ;;  %v4067_v29 = vand.u32 4294901760, %v4066_v42  ;;  %v4095_v60 = vand.u32 4294901760, %v4094_v55 }
 0x2a9   : > { %7532 = vmatprep.subr.bf16.mxu0 %v8690_v0  ;;  %7648 = vmatpush3.bf16.msra.mxu1 %v9630_v38 }
 0x2aa   : > { %7649 = vmatprep.subr.bf16.mxu1 %v8690_v0 }
 0x2ac   : > { %7534 = vmatpush3.bf16.msra.mxu0 %v7533_v33  ;;  %v4074_v33 = vand.u32 4294901760, %v4073_v43 }
 0x2ad   : > { %7535 = vmatprep.subr.bf16.mxu0 %v8690_v0  ;;  %7651 = vmatpush3.bf16.msra.mxu1 %v9642_v28 }
 0x2ae   : > { %7652 = vmatprep.subr.bf16.mxu1 %v8690_v0  ;;  %v7656_v45 = vpack.c.bf16 %v4074_v33, %v4067_v29  ;;  %v9792_v33 = vld [vmem:[#allocation14 + $0x10] sm:$0xff] }
 0x2af   : > { %6702 = vmatmul.mubr.f32.vlgmr.msra.gmra.mrb[2].mxu0 %v9538_v2  ;;  %v3059_v2 = vsub.f32 %v3057_v35, %v3058_v12 }
 0x2b0   : > { %7537 = vmatpush3.bf16.msra.mxu0 %v9542_v47  ;;  %6712 = vmatprep.mubr.msk.f32.mxu0 %vm8691_vm0, %v8692_v1 }
 0x2b1   : > { %7538 = vmatprep.subr.bf16.mxu0 %v8690_v0  ;;  %v3060_v8 = vand.u32 4294901760, %v3059_v2  ;;  %7654 = vmatpush3.bf16.msra.mxu1 %v9710_v27  ;;  %v3565_v2 = vpop.f32.mrb[6].mxu1 }
 0x2b2   : > { %7655 = vmatprep.subr.bf16.mxu1 %v8690_v0 }
 0x2b4   : > { %7540 = vmatpush3.bf16.msra.mxu0 %v9561_v56 }
 0x2b5   : > { %7541 = vmatprep.subr.bf16.mxu0 %v8690_v0 }
 0x2b7   : > { %6713 = vmatmul.mubr.f32.vlgmr.msra.gmra.mrb[2].mxu0 %v2100_v13  ;;  %v7587_v13 = vpack.c.bf16 %v3089_v5, %v3082_v4  ;;  %v4107_v4 = vand.u32 4294901760, %v9718_v32  ;;  %v4114_v5 = vand.u32 4294901760, %v9720_v34 }
 0x2b8   : > { %7543 = vmatpush3.bf16.msra.mxu0 %v7542_v39  ;;  %6723 = vmatprep.mubr.msk.f32.mxu0 %vm8691_vm0, %v8692_v1  ;;  %v4079_v39 = vand.u32 4294901760, %v9476_v14 }
 0x2b9   : > { %7544 = vmatprep.subr.bf16.mxu0 %v8690_v0  ;;  %v9750_v63 = vpack.c.bf16 %v4114_v5, %v4107_v4 }
 0x2bc   : > { %7546 = vmatpush3.bf16.msra.mxu0 %v7545_v46  ;;  %v4080_v46 = vsub.f32 %v9476_v14, %v4079_v39 }
 0x2bd   : > { %7547 = vmatprep.subr.bf16.mxu0 %v8690_v0 }
 0x2be   : > { %v4081_v50 = vand.u32 4294901760, %v4080_v46 }
 0x2bf   : > { %6724 = vmatmul.mubr.f32.vlgmr.msra.gmra.mrb[2].mxu0 %v9517_v37 }
 0x2c0   : > { %7549 = vmatpush3.bf16.msra.mxu0 %v9542_v47  ;;  %6734 = vmatprep.mubr.msk.f32.mxu0 %vm8691_vm0, %v8692_v1  ;;  %v7578_v47 = vpack.c.bf16 %v3078_v61, %v3071_v49  ;;  %v7659_v54 = vpack.c.bf16 %v4088_v51, %v4081_v50  ;;  %v9744_v49 = vpack.c.bf16 %v4072_v31, %v4065_v30  ;;  %v4557_v51 = vand.u32 4294901760, %v9800_v48 }
 0x2c1   : > { %7550 = vmatprep.subr.bf16.mxu0 %v8690_v0  ;;  %v9746_v61 = vpack.c.bf16 %v4086_v44, %v4079_v39  ;;  %v9794_v39 = vld [vmem:[#allocation14 + $0x18] sm:$0xff]  ;;  %v9796_v44 = vld [vmem:[#allocation14 + $0x20] sm:$0xff] }
 0x2c2   : > { %v4551_v46 = vand.u32 4294901760, %v9794_v39  ;;  %v4554_v50 = vand.u32 4294901760, %v9796_v44 }
 0x2c4   : > { %7552 = vmatpush3.bf16.msra.mxu0 %v9561_v56  ;;  %v7596_v56 = vpack.c.bf16 %v3076_v18, %v3069_v9  ;;  %v4108_v18 = vsub.f32 %v9718_v32, %v4107_v4  ;;  %v9823_v55 = vpack.c.bf16 %v4557_v51, %v4554_v50  ;;  %v9840_v4 = vld [vmem:[#allocation14 + $0x40] sm:$0xff] }
 0x2c5   : > { %7571 = vmatprep.subr.bf16.mxu0 %v8690_v0 }
 0x2c7   : > { %6735 = vmatmul.mubr.f32.vlgmr.msra.gmra.mrb[2].mxu0 %v9517_v37  ;;  %v7581_v37 = vpack.c.bf16 %v3092_v7, %v3085_v6 }
 0x2c8   : > { %7573 = vmatpush3.bf16.msra.mxu0 %v7572_v11  ;;  %6787 = vmatprep.mubr.msk.f32.mxu0 %vm8691_vm0, %v8692_v1 }
 0x2c9   : > { %7574 = vmatprep.subr.bf16.mxu0 %v8690_v0 }
 0x2cc   : > { %7576 = vmatpush3.bf16.msra.mxu0 %v7575_v40 }
 0x2cd   : > { %7577 = vmatprep.subr.bf16.mxu0 %v8690_v0 }
 0x2cf   : > { %6788 = vmatmul.mubr.f32.vlgmr.msra.gmra.mrb[2].mxu0 %v3060_v8 }
 0x2d0   : > { %7579 = vmatpush3.bf16.msra.mxu0 %v7578_v47  ;;  %6798 = vmatprep.mubr.msk.f32.mxu0 %vm8691_vm0, %v8692_v1  ;;  %v6855_v47 = vpop.f32.mrb[7].mxu1 }
 0x2d1   : > { %7580 = vmatprep.subr.bf16.mxu0 %v8690_v0  ;;  %v9892_v47 = vld [vmem:[#allocation14 + $0x70] sm:$0xff] }
 0x2d4   : > { %7582 = vmatpush3.bf16.msra.mxu0 %v7581_v37 }
 0x2d5   : > { %7583 = vmatprep.subr.bf16.mxu0 %v8690_v0 }
 0x2d7   : > { %6799 = vmatmul.mubr.f32.vlgmr.msra.gmra.mrb[2].mxu0 %v9663_v3 }
 0x2d8   : > { %7585 = vmatpush3.bf16.msra.mxu0 %v7584_v10  ;;  %6809 = vmatprep.mubr.msk.f32.mxu0 %vm8691_vm0, %v8692_v1 }
 0x2d9   : > { %7586 = vmatprep.subr.bf16.mxu0 %v8690_v0 }
 0x2dc   : > { %7588 = vmatpush3.bf16.msra.mxu0 %v7587_v13 }
 0x2dd   : > { %7589 = vmatprep.subr.bf16.mxu0 %v8690_v0 }
 0x2df   : > { %6810 = vmatmul.mubr.f32.vlgmr.msra.gmra.mrb[2].mxu0 %v3057_v35  ;;  %v4115_v35 = vsub.f32 %v9720_v34, %v4114_v5  ;;  %v9842_v5 = vld [vmem:[#allocation14 + $0x48] sm:$0xff] }
 0x2e0   : > { %7591 = vmatpush3.bf16.msra.mxu0 %v7572_v11  ;;  %6820 = vmatprep.mubr.msk.f32.mxu0 %vm8691_vm0, %v8692_v1 }
 0x2e1   : > { %7592 = vmatprep.subr.bf16.mxu0 %v8690_v0  ;;  %v4116_v22 = vand.u32 4294901760, %v4115_v35 }
 0x2e4   : > { %7594 = vmatpush3.bf16.msra.mxu0 %v7575_v40 }
 0x2e5   : > { %7595 = vmatprep.subr.bf16.mxu0 %v8690_v0 }
 0x2e7   : > { %6821 = vmatmul.mubr.f32.vlgmr.msra.gmra.mrb[2].mxu0 %v3058_v12  ;;  %v7674_v12 = vpack.c.bf16 %v9494_v20, %v9488_v19 }
 0x2e8   : > { %7597 = vmatpush3.bf16.msra.mxu0 %v7596_v56  ;;  %6831 = vmatprep.mubr.msk.f32.mxu0 %vm8691_vm0, %v8692_v1 }
 0x2e9   : > { %7598 = vmatprep.subr.bf16.mxu0 %v8690_v0 }
 0x2ec   : > { %7600 = vmatpush3.bf16.msra.mxu0 %v7599_v17 }
 0x2ed   : > { %7601 = vmatprep.subr.bf16.mxu0 %v8690_v0 }
 0x2ef   : > { %6832 = vmatmul.mubr.f32.vlgmr.msra.gmra.mrb[2].mxu0 %v9663_v3 }
 0x2f0   : > { %7603 = vmatpush3.bf16.msra.mxu0 %v7572_v11  ;;  %6842 = vmatprep.mubr.msk.f32.mxu0 %vm8691_vm0, %v8692_v1  ;;  %v4109_v11 = vand.u32 4294901760, %v4108_v18  ;;  %v4569_v18 = vand.u32 4294901760, %v9842_v5 }
 0x2f1   : > { %7604 = vmatprep.subr.bf16.mxu0 %v8690_v0 }
 0x2f2   : > { %v7665_v24 = vpack.c.bf16 %v4116_v22, %v4109_v11  ;;  %v9856_v11 = vld [vmem:[#allocation14 + $0x50] sm:$0xff]  ;;  %v9858_v22 = vld [vmem:[#allocation14 + $0x58] sm:$0xff] }
 0x2f4   : > { %7606 = vmatpush3.bf16.msra.mxu0 %v7575_v40  ;;  %v7677_v40 = vpack.c.bf16 %v9720_v34, %v9718_v32 }
 0x2f5   : > { %7703 = vmatprep.subr.bf16.mxu0 %v8690_v0 }
 0x2f7   : > { %6843 = vmatmul.mubr.f32.vlgmr.msra.gmra.mrb[2].mxu0 %v9663_v3  ;;  %v4102_v3 = vand.u32 4294901760, %v4101_v57  ;;  %v4560_v57 = vand.u32 4294901760, %v9813_v53 }
 0x2f8   : > { %7705 = vmatpush3.bf16.msra.mxu0 %v9617_v41  ;;  %7022 = vmatprep.mubr.msk.f32.mxu0 %vm8691_vm0, %v8692_v1 }
 0x2f9   : > { %7706 = vmatprep.subr.bf16.mxu0 %v8690_v0  ;;  %v7662_v9 = vpack.c.bf16 %v4102_v3, %v4095_v60 }
 0x2fc   : > { %7708 = vmatpush3.bf16.msra.mxu0 %v9630_v38 }
 0x2fd   : > { %7709 = vmatprep.subr.bf16.mxu0 %v8690_v0 }
 0x300   : > { %7711 = vmatpush3.bf16.msra.mxu0 %v9642_v28 }
 0x301   : > { %7712 = vmatprep.subr.bf16.mxu0 %v8690_v0 }
 0x304   : > { %7714 = vmatpush3.bf16.msra.mxu0 %v9710_v27 }
 0x305   : > { %7859 = vmatprep.subr.bf16.mxu0 %v8690_v0 }
 0x357   : > { %v3656_v58 = vpop.f32.mrb[8].mxu1 }
 0x358   : > { %v3657_v59 = vadd.f32 %v3656_v58, %v3565_v2  ;;  %v6866_v6 = vpop.f32.mrb[9].mxu1  ;;  %v9894_v58 = vld [vmem:[#allocation14 + $0x78] sm:$0xff] }
 0x359   : > { %v4587_v6 = vand.u32 4294901760, %v9894_v58 }
 0x35f   : > { %v3736_v14 = vpop.f32.mrb[10].mxu1 }
 0x360   : > { %v3737_v15 = vadd.f32 %v3736_v14, %v3657_v59  ;;  %v6877_v7 = vpop.f32.mrb[11].mxu1  ;;  %v4584_v59 = vand.u32 4294901760, %v9892_v47 }
 0x362   : > { %v9908_v7 = vpack.c.bf16 %v4587_v6, %v4584_v59 }
 0x367   : > { %v3813_v19 = vpop.f32.mrb[12].mxu1 }
 0x368   : > { %v3814_v20 = vadd.f32 %v3813_v19, %v3737_v15  ;;  %v6888_v8 = vpop.f32.mrb[13].mxu1 }
 0x36f   : > { %v3896_v37 = vpop.f32.mrb[14].mxu1 }
 0x370   : > { %v3897_v10 = vadd.f32 %v3896_v37, %v3814_v20  ;;  %v6899_v13 = vpop.f32.mrb[15].mxu1  ;;  %v9924_v37 = vsub.f32 %v9794_v39, %v4551_v46 }
 0x377   : > { %v3971_v56 = vpop.f32.mrb[16].mxu1 }
 0x378   : > { %v9752_v17 = vadd.f32 %v3971_v56, %v3897_v10  ;;  %v6910_v23 = vpop.f32.mrb[17].mxu1 }
 0x379   : > { %v4656_v23 = vand.u32 4294901760, %v9924_v37 }
 0x3ca   : > { %v3468_v25 = vpop.f32.mrb[2].mxu0 }
 0x3cb   : > { %v3473_v26 = vmax.f32 %v3468_v25, 0.0  ;;  %v6844_v21 = vpop.f32.mrb[3].mxu0 }
 0x3cc   : > { %v4657_v21 = vsub.f32 %v9924_v37, %v4656_v23 }
 0x3cd   : > { %v3977_v30 = vsel %vm3975_vm3, %v3473_v26, 0 }
 0x3ce   : > { %v4052_v31 = vand.u32 4294901760, %v3977_v30 }
 0x3d0   : > { %v4053_v32 = vsub.f32 %v3977_v30, %v4052_v31  ;;  %7023 = vmatmul.mubr.f32.vlgmr.msra.gmra.mrb[4].mxu0 %v4052_v31  ;;  %v9943_v30 = vsub.f32 %v9796_v44, %v4554_v50 }
 0x3d1   : > { %7267 = vmatprep.mubr.msk.f32.mxu0 %vm8691_vm0, %v8692_v1 }
 0x3d2   : > { %v4054_v34 = vand.u32 4294901760, %v4053_v32 }
 0x3d4   : > { %v4055_v42 = vsub.f32 %v4053_v32, %v4054_v34 }
 0x3d6   : > { %v4056_v43 = vand.u32 4294901760, %v4055_v42  ;;  %v10498_v42 = vand.u32 4294901760, %v9943_v30 }
 0x3d8   : > { %6928 = vmatmul.mubr.f32.vlgmr.msra.gmra.mrb[18].mxu1 %v4056_v43 }
 0x3d9   : > { %7657 = vmatpush3.bf16.msra.mxu1 %v7656_v45  ;;  %6946 = vmatprep.mubr.msk.f32.mxu1 %vm8691_vm0, %v8692_v1  ;;  %v4548_v45 = vand.u32 4294901760, %v9792_v33 }
 0x3da   : > { %7658 = vmatprep.subr.bf16.mxu1 %v8690_v0 }
 0x3db   : > { %v9811_v52 = vpack.c.bf16 %v4551_v46, %v4548_v45  ;;  %v9919_v8 = vsub.f32 %v9792_v33, %v4548_v45 }
 0x3dd   : > { %7660 = vmatpush3.bf16.msra.mxu1 %v7659_v54  ;;  %v9815_v54 = vld [vmem:[#allocation14 + $0x38] sm:$0xff]  ;;  %v4649_v56 = vand.u32 4294901760, %v9919_v8 }
 0x3de   : > { %7661 = vmatprep.subr.bf16.mxu1 %v8690_v0  ;;  %v4563_v60 = vand.u32 4294901760, %v9815_v54 }
 0x3df   : > { %v4650_v26 = vsub.f32 %v9919_v8, %v4649_v56 }
 0x3e0   : > { %v9835_v3 = vpack.c.bf16 %v4563_v60, %v4560_v57  ;;  %v9968_v33 = vsub.f32 %v9815_v54, %v4563_v60 }
 0x3e1   : > { %7663 = vmatpush3.bf16.msra.mxu1 %v7662_v9  ;;  %v4566_v9 = vand.u32 4294901760, %v9840_v4 }
 0x3e2   : > { %7664 = vmatprep.subr.bf16.mxu1 %v8690_v0  ;;  %v10495_v46 = vand.u32 4294901760, %v9968_v33 }
 0x3e3   : > { %v9854_v35 = vpack.c.bf16 %v4569_v18, %v4566_v9 }
 0x3e4   : > { %v4685_v54 = vsub.f32 %v9968_v33, %v10495_v46  ;;  %v6080_v46 = vld [vmem:[%s10582_s5] ss:$0 sm:$0xff]  ;;  %s8511_s5 = scalar_lea.vmem %s10360_s15, 128 }
 0x3e5   : > { %7666 = vmatpush3.bf16.msra.mxu1 %v7665_v24  ;;  %v4572_v24 = vand.u32 4294901760, %v9856_v11  ;;  %p8512_p3 = scmp.ne.s32.totalorder %s10360_s15, %s8511_s5  ;;  %p8519_p0 = scmp.lt.s32.totalorder %s8517_s26, %s8511_s5 }
 0x3e6   : > { %7667 = vmatprep.subr.bf16.mxu1 %v8690_v0 }
 0x3e7   : > { %p8513_p1 = pnand %p8512_p3, %p10601_p9  ;;  %p8520_p2 = por %p8519_p0, %p8518_p4 }
 0x3e8   : > { %6947 = vmatmul.mubr.f32.vlgmr.msra.gmra.mrb[20].mxu1 %v4052_v31 }
 0x3e9   : > { %7669 = vmatpush3.bf16.msra.mxu1 %v7668_v36  ;;  %6965 = vmatprep.mubr.msk.f32.mxu1 %vm8691_vm0, %v8692_v1  ;;  %v4575_v36 = vand.u32 4294901760, %v9858_v22  ;;  %p8514_p7 = pneg %p8513_p1 }
 0x3ea   : > { %7670 = vmatprep.subr.bf16.mxu1 %v8690_v0 }
 0x3eb   : > { %p8521_p6 = pnand %p8520_p2, %p8514_p7 }
 0x3ed   : > { %7672 = vmatpush3.bf16.msra.mxu1 %v7671_v16  ;;  %v9870_v16 = vpack.c.bf16 %v4575_v36, %v4572_v24 }
 0x3ee   : > { %7673 = vmatprep.subr.bf16.mxu1 %v8690_v0 }
 0x3f1   : > { %7675 = vmatpush3.bf16.msra.mxu1 %v7674_v12  ;;  %v9872_v12 = vld [vmem:[#allocation14 + $0x60] sm:$0xff] }
 0x3f2   : > { %7676 = vmatprep.subr.bf16.mxu1 %v8690_v0 }
 0x3f5   : > { %7678 = vmatpush3.bf16.msra.mxu1 %v7677_v40  ;;  %v9874_v40 = vld [vmem:[#allocation14 + $0x68] sm:$0xff] }
 0x3f6   : > { %7679 = vmatprep.subr.bf16.mxu1 %v8690_v0 }
 0x3f8   : > { %6966 = vmatmul.mubr.f32.vlgmr.msra.gmra.mrb[22].mxu1 %v4053_v32  ;;  %v4651_v32 = vand.u32 4294901760, %v4650_v26 }
 0x3f9   : > { %7681 = vmatpush3.bf16.msra.mxu1 %v9617_v41  ;;  %6984 = vmatprep.mubr.msk.f32.mxu1 %vm8691_vm0, %v8692_v1  ;;  %v4525_v41 = vld [vmem:[#allocation14] sm:$0xff] }
 0x3fa   : > { %7682 = vmatprep.subr.bf16.mxu1 %v8690_v0 }
 0x3fd   : > { %7684 = vmatpush3.bf16.msra.mxu1 %v9630_v38  ;;  %v4526_v38 = vld [vmem:[#allocation14 + $0x8] sm:$0xff] }
 0x3fe   : > { %7685 = vmatprep.subr.bf16.mxu1 %v8690_v0 }
 0x401   : > { %7687 = vmatpush3.bf16.msra.mxu1 %v9642_v28  ;;  %v4542_v28 = vand.u32 4294901760, %v4525_v41 }
 0x402   : > { %7688 = vmatprep.subr.bf16.mxu1 %v8690_v0 }
 0x405   : > { %7690 = vmatpush3.bf16.msra.mxu1 %v9710_v27  ;;  %v4545_v27 = vand.u32 4294901760, %v4526_v38 }
 0x406   : > { %7691 = vmatprep.subr.bf16.mxu1 %v8690_v0 }
 0x407   : > { %v9790_v29 = vpack.c.bf16 %v4545_v27, %v4542_v28  ;;  %v9890_v2 = vsub.f32 %v4526_v38, %v4545_v27  ;;  %v4664_v38 = vsub.f32 %v9943_v30, %v10498_v42  ;;  %v9963_v27 = vsub.f32 %v9813_v53, %v4560_v57 }
 0x408   : > { %6985 = vmatmul.mubr.f32.vlgmr.msra.gmra.mrb[24].mxu1 %v4054_v34  ;;  %v4658_v34 = vand.u32 4294901760, %v4657_v21  ;;  %v9985_v53 = vsub.f32 %v9842_v5, %v4569_v18  ;;  %v10001_v5 = vsub.f32 %v9856_v11, %v4572_v24  ;;  %v10006_v18 = vsub.f32 %v9858_v22, %v4575_v36 }
 0x409   : > { %7693 = vmatpush3.bf16.msra.mxu1 %v9744_v49  ;;  %7003 = vmatprep.mubr.msk.f32.mxu1 %vm8691_vm0, %v8692_v1  ;;  %v4578_v49 = vand.u32 4294901760, %v9872_v12  ;;  %v4642_v15 = vand.u32 4294901760, %v9890_v2  ;;  %v4665_v39 = vand.u32 4294901760, %v4664_v38  ;;  %v10496_v45 = vand.u32 4294901760, %v9963_v27 }
 0x40a   : > { %7694 = vmatprep.subr.bf16.mxu1 %v8690_v0  ;;  %7861 = vmatpush3.bf16.msra.mxu0 %v9790_v29  ;;  %v10492_v21 = vand.u32 4294901760, %v10001_v5 }
 0x40b   : > { %7862 = vmatprep.subr.bf16.mxu0 %v8690_v0  ;;  %v4643_v20 = vsub.f32 %v9890_v2, %v4642_v15  ;;  %v4678_v50 = vsub.f32 %v9963_v27, %v10496_v45  ;;  %v10023_v22 = vsub.f32 %v9872_v12, %v4578_v49  ;;  %v10040_v12 = vsub.f32 %v9892_v47, %v4584_v59 }
 0x40c   : > { %v4706_v11 = vsub.f32 %v10001_v5, %v10492_v21 }
 0x40d   : > { %7696 = vmatpush3.bf16.msra.mxu1 %v9746_v61  ;;  %v4581_v61 = vand.u32 4294901760, %v9874_v40  ;;  %v4644_v13 = vand.u32 4294901760, %v4643_v20  ;;  %v4679_v57 = vand.u32 4294901760, %v4678_v50  ;;  %v4686_v20 = vand.u32 4294901760, %v4685_v54 }
 0x40e   : > { %7697 = vmatprep.subr.bf16.mxu1 %v8690_v0  ;;  %7864 = vmatpush3.bf16.msra.mxu0 %v9811_v52  ;;  %v4707_v38 = vand.u32 4294901760, %v4706_v11  ;;  %v10068_v11 = vpack.c.bf16 %v9924_v37, %v9919_v8  ;;  %v10586_v8 = vand.u32 4294901760, %v9968_v33 }
 0x40f   : > { %7865 = vmatprep.subr.bf16.mxu0 %v8690_v0  ;;  %v10028_v36 = vsub.f32 %v9874_v40, %v4581_v61  ;;  %v10045_v40 = vsub.f32 %v9894_v58, %v4587_v6 }
 0x411   : > { %7699 = vmatpush3.bf16.msra.mxu1 %v9748_v62  ;;  %v9886_v62 = vpack.c.bf16 %v4581_v61, %v4578_v49 }
 0x412   : > { %7700 = vmatprep.subr.bf16.mxu1 %v8690_v0  ;;  %7867 = vmatpush3.bf16.msra.mxu0 %v9823_v55 }
 0x413   : > { %7868 = vmatprep.subr.bf16.mxu0 %v8690_v0 }
 0x415   : > { %7702 = vmatpush3.bf16.msra.mxu1 %v9750_v63  ;;  %v9888_v63 = vsub.f32 %v4525_v41, %v4542_v28  ;;  %v9952_v41 = vpack.c.bf16 %v4658_v34, %v4651_v32  ;;  %v10491_v32 = vand.u32 4294901760, %v10006_v18 }
 0x416   : > { %7715 = vmatprep.subr.bf16.mxu1 %v8690_v0  ;;  %7870 = vmatpush3.bf16.msra.mxu0 %v9835_v3 }
 0x417   : > { %7871 = vmatprep.subr.bf16.mxu0 %v8690_v0  ;;  %v4635_v14 = vand.u32 4294901760, %v9888_v63  ;;  %v4713_v24 = vsub.f32 %v10006_v18, %v10491_v32 }
 0x418   : > { %7004 = vmatmul.mubr.f32.vlgmr.msra.gmra.mrb[26].mxu1 %v4052_v31  ;;  %v9948_v31 = vsub.f32 %v9800_v48, %v4557_v51  ;;  %v9980_v51 = vsub.f32 %v9840_v4, %v4566_v9 }
 0x419   : > { %7057 = vmatprep.mubr.msk.f32.mxu1 %vm8691_vm0, %v8692_v1  ;;  %7717 = vmatpush3.bf16.msra.mxu1 %v9790_v29  ;;  %v4636_v19 = vsub.f32 %v9888_v63, %v4635_v14 }
 0x41a   : > { %7718 = vmatprep.subr.bf16.mxu1 %v8690_v0  ;;  %7873 = vmatpush3.bf16.msra.mxu0 %v9854_v35  ;;  %v10497_v43 = vand.u32 4294901760, %v9948_v31  ;;  %v10494_v60 = vand.u32 4294901760, %v9980_v51 }
 0x41b   : > { %7874 = vmatprep.subr.bf16.mxu0 %v8690_v0  ;;  %v4637_v10 = vand.u32 4294901760, %v4636_v19  ;;  %v10493_v19 = vand.u32 4294901760, %v9985_v53 }
 0x41c   : > { %v4671_v28 = vsub.f32 %v9948_v31, %v10497_v43  ;;  %v4692_v4 = vsub.f32 %v9980_v51, %v10494_v60 }
 0x41d   : > { %7720 = vmatpush3.bf16.msra.mxu1 %v9811_v52  ;;  %v9932_v25 = vpack.c.bf16 %v4644_v13, %v4637_v10  ;;  %v4699_v9 = vsub.f32 %v9985_v53, %v10493_v19  ;;  %v10008_v10 = vpack.c.bf16 %v4686_v20, %v4679_v57  ;;  %v10488_v57 = vand.u32 4294901760, %v10040_v12 }
 0x41e   : > { %7721 = vmatprep.subr.bf16.mxu1 %v8690_v0  ;;  %7876 = vmatpush3.bf16.msra.mxu0 %v9870_v16  ;;  %v4672_v44 = vand.u32 4294901760, %v4671_v28  ;;  %v4693_v13 = vand.u32 4294901760, %v4692_v4  ;;  %v4714_v28 = vand.u32 4294901760, %v4713_v24  ;;  %v10487_v20 = vand.u32 4294901760, %v10045_v40 }
 0x41f   : > { %7877 = vmatprep.subr.bf16.mxu0 %v8690_v0  ;;  %v4700_v26 = vand.u32 4294901760, %v4699_v9  ;;  %v4734_v47 = vsub.f32 %v10040_v12, %v10488_v57 }
 0x420   : > { %v9972_v48 = vpack.c.bf16 %v4672_v44, %v4665_v39  ;;  %v10490_v39 = vand.u32 4294901760, %v10023_v22  ;;  %v10489_v44 = vand.u32 4294901760, %v10028_v36  ;;  %v10032_v50 = vpack.c.bf16 %v4714_v28, %v4707_v38 }
 0x421   : > { %7723 = vmatpush3.bf16.msra.mxu1 %v9823_v55  ;;  %v10012_v34 = vpack.c.bf16 %v4700_v26, %v4693_v13  ;;  %v4741_v59 = vsub.f32 %v10045_v40, %v10487_v20  ;;  %v4735_v6 = vand.u32 4294901760, %v4734_v47  ;;  %v10064_v26 = vpack.c.bf16 %v9890_v2, %v9888_v63 }
 0x422   : > { %7724 = vmatprep.subr.bf16.mxu1 %v8690_v0  ;;  %7879 = vmatpush3.bf16.msra.mxu0 %v9886_v62  ;;  %v4720_v54 = vsub.f32 %v10023_v22, %v10490_v39  ;;  %v4727_v49 = vsub.f32 %v10028_v36, %v10489_v44  ;;  %v10072_v28 = vpack.c.bf16 %v9948_v31, %v9943_v30  ;;  %v10583_v63 = vand.u32 4294901760, %v9943_v30 }
 0x423   : > { %7880 = vmatprep.subr.bf16.mxu0 %v8690_v0  ;;  %v4742_v9 = vand.u32 4294901760, %v4741_v59  ;;  %v10081_v47 = vpack.c.bf16 %v9985_v53, %v9980_v51  ;;  %v10085_v59 = vpack.c.bf16 %v10006_v18, %v10001_v5  ;;  %v10584_v2 = vand.u32 4294901760, %v9948_v31 }
 0x424   : > { %v4721_v61 = vand.u32 4294901760, %v4720_v54  ;;  %v4728_v4 = vand.u32 4294901760, %v4727_v49  ;;  %v10076_v54 = vpack.c.bf16 %v9968_v33, %v9963_v27  ;;  %v10589_v31 = vand.u32 4294901760, %v10001_v5 }
 0x425   : > { %7726 = vmatpush3.bf16.msra.mxu1 %v9835_v3  ;;  %v10060_v13 = vpack.c.bf16 %v4742_v9, %v4735_v6  ;;  %v10089_v6 = vpack.c.bf16 %v10028_v36, %v10023_v22  ;;  %v10093_v9 = vpack.c.bf16 %v10045_v40, %v10040_v12 }
 0x426   : > { %7727 = vmatprep.subr.bf16.mxu1 %v8690_v0  ;;  %7882 = vmatpush3.bf16.msra.mxu0 %v9908_v7  ;;  %v10058_v58 = vpack.c.bf16 %v4728_v4, %v4721_v61 }
 0x427   : > { %7883 = vmatprep.subr.bf16.mxu0 %v8690_v0 }
 0x429   : > { %7729 = vmatpush3.bf16.msra.mxu1 %v9854_v35 }
 0x42a   : > { %7730 = vmatprep.subr.bf16.mxu1 %v8690_v0 }
 0x42d   : > { %7732 = vmatpush3.bf16.msra.mxu1 %v9870_v16 }
 0x42e   : > { %7733 = vmatprep.subr.bf16.mxu1 %v8690_v0 }
 0x431   : > { %7735 = vmatpush3.bf16.msra.mxu1 %v9886_v62 }
 0x432   : > { %7736 = vmatprep.subr.bf16.mxu1 %v8690_v0 }
 0x435   : > { %7738 = vmatpush3.bf16.msra.mxu1 %v9908_v7 }
 0x436   : > { %7739 = vmatprep.subr.bf16.mxu1 %v8690_v0 }
 0x4a3   : > { %v4512_v24 = vpop.f32.mrb[4].mxu0 }
 0x4a4   : > { %v7024_v38 = vpop.f32.mrb[5].mxu0 }
 0x4ab   : > { %v4058_v49 = vpop.f32.mrb[18].mxu1 }
 0x4ac   : > { %v4059_v61 = vadd.f32 %v4058_v49, %v9752_v17  ;;  %v6929_v4 = vpop.f32.mrb[19].mxu1 }
 0x4bb   : > { %v4169_v38 = vpop.f32.mrb[20].mxu1 }
 0x4bc   : > { %v4170_v20 = vadd.f32 %v4169_v38, %v4059_v61  ;;  %v6948_v17 = vpop.f32.mrb[21].mxu1 }
 0x4cb   : > { %v4257_v49 = vpop.f32.mrb[22].mxu1 }
 0x4cc   : > { %v4258_v4 = vadd.f32 %v4257_v49, %v4170_v20  ;;  %v6967_v57 = vpop.f32.mrb[23].mxu1 }
 0x4db   : > { %v4338_v44 = vpop.f32.mrb[24].mxu1 }
 0x4dc   : > { %v4339_v39 = vadd.f32 %v4338_v44, %v4258_v4  ;;  %v6986_v32 = vpop.f32.mrb[25].mxu1 }
 0x4eb   : > { %v4433_v21 = vpop.f32.mrb[26].mxu1 }
 0x4ec   : > { %v4434_v19 = vadd.f32 %v4433_v21, %v4339_v39  ;;  %v7005_v60 = vpop.f32.mrb[27].mxu1 }
 0x4ed   : > { %v10593_v60 = vand.u32 4294901760, %v10040_v12 }
 0x4ee   : > { %v4513_v45 = vadd.f32 %v4512_v24, %v4434_v19  ;;  %v10594_v19 = vand.u32 4294901760, %v10045_v40 }
 0x4f0   : > { %v4523_v43 = vadd.f32 %v6080_v46, %v4513_v45  ;;  %v10171_v45 = vpack.c.bf16 %v4656_v23, %v4649_v56  ;;  %v10587_v56 = vand.u32 4294901760, %v9980_v51  ;;  %v10588_v23 = vand.u32 4294901760, %v9985_v53 }
 0x4f1   : > { %v10591_v46 = vand.u32 4294901760, %v10023_v22  ;;  %v10592_v51 = vand.u32 4294901760, %v10028_v36  ;;  %v10221_v5 = vpack.c.bf16 %v10594_v19, %v10593_v60 }
 0x4f2   : > { %v10098_v42 = vmax.f32 %v4523_v43, 0.0  ;;  %v10163_v43 = vpack.c.bf16 %v4642_v15, %v4635_v14  ;;  %v10181_v14 = vpack.c.bf16 %v10584_v2, %v10583_v63  ;;  %v10585_v15 = vand.u32 4294901760, %v9963_v27 }
 0x4f3   : > { %v10197_v30 = vpack.c.bf16 %v10588_v23, %v10587_v56  ;;  %v10590_v27 = vand.u32 4294901760, %v10006_v18  ;;  %v10213_v53 = vpack.c.bf16 %v10592_v51, %v10591_v46 }
 0x4f4   : > { %v10101_v61 = vand.u32 4294901760, %v10098_v42  ;;  %v10189_v37 = vpack.c.bf16 %v10586_v8, %v10585_v15 }
 0x4f5   : > { %v10205_v33 = vpack.c.bf16 %v10590_v27, %v10589_v31 }
 0x4f6   : > { %v4623_v57 = vsub.f32 %v10098_v42, %v10101_v61 }
 0x4f8   : > { %v4624_v20 = vand.u32 4294901760, %v4623_v57 }
 0x4fa   : > { %v4625_v44 = vsub.f32 %v4623_v57, %v4624_v20 }
 0x4fc   : > { %v4626_v32 = vand.u32 4294901760, %v4625_v44 }
 0x4fe   : > { %7058 = vmatmul.mubr.f32.vlgmr.msra.gmra.mrb[28].mxu1 %v4626_v32 }
 0x4ff   : > { %7741 = vmatpush3.bf16.msra.mxu1 %v9932_v25  ;;  %7092 = vmatprep.mubr.msk.f32.mxu1 %vm8691_vm0, %v8692_v1 }
 0x500   : > { %7742 = vmatprep.subr.bf16.mxu1 %v8690_v0 }
 0x503   : > { %7744 = vmatpush3.bf16.msra.mxu1 %v9952_v41 }
 0x504   : > { %7745 = vmatprep.subr.bf16.mxu1 %v8690_v0 }
 0x507   : > { %7747 = vmatpush3.bf16.msra.mxu1 %v9972_v48 }
 0x508   : > { %7748 = vmatprep.subr.bf16.mxu1 %v8690_v0 }
 0x50b   : > { %7750 = vmatpush3.bf16.msra.mxu1 %v10008_v10 }
 0x50c   : > { %7751 = vmatprep.subr.bf16.mxu1 %v8690_v0 }
 0x50f   : > { %7753 = vmatpush3.bf16.msra.mxu1 %v10012_v34 }
 0x510   : > { %7754 = vmatprep.subr.bf16.mxu1 %v8690_v0 }
 0x513   : > { %7756 = vmatpush3.bf16.msra.mxu1 %v10032_v50 }
 0x514   : > { %7757 = vmatprep.subr.bf16.mxu1 %v8690_v0 }
 0x517   : > { %7759 = vmatpush3.bf16.msra.mxu1 %v10058_v58 }
 0x518   : > { %7760 = vmatprep.subr.bf16.mxu1 %v8690_v0 }
 0x51b   : > { %7762 = vmatpush3.bf16.msra.mxu1 %v10060_v13 }
 0x51c   : > { %7763 = vmatprep.subr.bf16.mxu1 %v8690_v0 }
 0x51e   : > { %7093 = vmatmul.mubr.f32.vlgmr.msra.gmra.mrb[28].mxu1 %v10101_v61 }
 0x51f   : > { %7765 = vmatpush3.bf16.msra.mxu1 %v10064_v26  ;;  %7127 = vmatprep.mubr.msk.f32.mxu1 %vm8691_vm0, %v8692_v1 }
 0x520   : > { %7766 = vmatprep.subr.bf16.mxu1 %v8690_v0 }
 0x523   : > { %7768 = vmatpush3.bf16.msra.mxu1 %v10068_v11 }
 0x524   : > { %7769 = vmatprep.subr.bf16.mxu1 %v8690_v0 }
 0x527   : > { %7771 = vmatpush3.bf16.msra.mxu1 %v10072_v28 }
 0x528   : > { %7772 = vmatprep.subr.bf16.mxu1 %v8690_v0 }
 0x52b   : > { %7774 = vmatpush3.bf16.msra.mxu1 %v10076_v54 }
 0x52c   : > { %7775 = vmatprep.subr.bf16.mxu1 %v8690_v0 }
 0x52f   : > { %7777 = vmatpush3.bf16.msra.mxu1 %v10081_v47 }
 0x530   : > { %7778 = vmatprep.subr.bf16.mxu1 %v8690_v0 }
 0x533   : > { %7780 = vmatpush3.bf16.msra.mxu1 %v10085_v59 }
 0x534   : > { %7781 = vmatprep.subr.bf16.mxu1 %v8690_v0 }
 0x537   : > { %7783 = vmatpush3.bf16.msra.mxu1 %v10089_v6 }
 0x538   : > { %7784 = vmatprep.subr.bf16.mxu1 %v8690_v0 }
 0x53b   : > { %7786 = vmatpush3.bf16.msra.mxu1 %v10093_v9 }
 0x53c   : > { %7787 = vmatprep.subr.bf16.mxu1 %v8690_v0 }
 0x53e   : > { %7128 = vmatmul.mubr.f32.vlgmr.msra.gmra.mrb[28].mxu1 %v4623_v57 }
 0x53f   : > { %7789 = vmatpush3.bf16.msra.mxu1 %v9790_v29  ;;  %7162 = vmatprep.mubr.msk.f32.mxu1 %vm8691_vm0, %v8692_v1 }
 0x540   : > { %7790 = vmatprep.subr.bf16.mxu1 %v8690_v0 }
 0x543   : > { %7792 = vmatpush3.bf16.msra.mxu1 %v9811_v52 }
 0x544   : > { %7793 = vmatprep.subr.bf16.mxu1 %v8690_v0 }
 0x547   : > { %7795 = vmatpush3.bf16.msra.mxu1 %v9823_v55 }
 0x548   : > { %7796 = vmatprep.subr.bf16.mxu1 %v8690_v0 }
 0x54b   : > { %7798 = vmatpush3.bf16.msra.mxu1 %v9835_v3 }
 0x54c   : > { %7799 = vmatprep.subr.bf16.mxu1 %v8690_v0 }
 0x54f   : > { %7801 = vmatpush3.bf16.msra.mxu1 %v9854_v35 }
 0x550   : > { %7802 = vmatprep.subr.bf16.mxu1 %v8690_v0 }
 0x553   : > { %7804 = vmatpush3.bf16.msra.mxu1 %v9870_v16 }
 0x554   : > { %7805 = vmatprep.subr.bf16.mxu1 %v8690_v0 }
 0x557   : > { %7807 = vmatpush3.bf16.msra.mxu1 %v9886_v62 }
 0x558   : > { %7808 = vmatprep.subr.bf16.mxu1 %v8690_v0 }
 0x55b   : > { %7810 = vmatpush3.bf16.msra.mxu1 %v9908_v7 }
 0x55c   : > { %7811 = vmatprep.subr.bf16.mxu1 %v8690_v0 }
 0x55e   : > { %7163 = vmatmul.mubr.f32.vlgmr.msra.gmra.mrb[28].mxu1 %v4624_v20 }
 0x55f   : > { %7813 = vmatpush3.bf16.msra.mxu1 %v10163_v43  ;;  %7197 = vmatprep.mubr.msk.f32.mxu1 %vm8691_vm0, %v8692_v1 }
 0x560   : > { %7814 = vmatprep.subr.bf16.mxu1 %v8690_v0 }
 0x563   : > { %7816 = vmatpush3.bf16.msra.mxu1 %v10171_v45 }
 0x564   : > { %7817 = vmatprep.subr.bf16.mxu1 %v8690_v0 }
 0x567   : > { %7819 = vmatpush3.bf16.msra.mxu1 %v10181_v14 }
 0x568   : > { %7820 = vmatprep.subr.bf16.mxu1 %v8690_v0 }
 0x56b   : > { %7822 = vmatpush3.bf16.msra.mxu1 %v10189_v37 }
 0x56c   : > { %7823 = vmatprep.subr.bf16.mxu1 %v8690_v0 }
 0x56f   : > { %7825 = vmatpush3.bf16.msra.mxu1 %v10197_v30 }
 0x570   : > { %7826 = vmatprep.subr.bf16.mxu1 %v8690_v0 }
 0x573   : > { %7828 = vmatpush3.bf16.msra.mxu1 %v10205_v33 }
 0x574   : > { %7829 = vmatprep.subr.bf16.mxu1 %v8690_v0 }
 0x577   : > { %7831 = vmatpush3.bf16.msra.mxu1 %v10213_v53 }
 0x578   : > { %7832 = vmatprep.subr.bf16.mxu1 %v8690_v0 }
 0x57b   : > { %7834 = vmatpush3.bf16.msra.mxu1 %v10221_v5 }
 0x57c   : > { %7835 = vmatprep.subr.bf16.mxu1 %v8690_v0 }
 0x57e   : > { %7198 = vmatmul.mubr.f32.vlgmr.msra.gmra.mrb[28].mxu1 %v10101_v61 }
 0x57f   : > { %7837 = vmatpush3.bf16.msra.mxu1 %v9790_v29  ;;  %7232 = vmatprep.mubr.msk.f32.mxu1 %vm8691_vm0, %v8692_v1 }
 0x580   : > { %7838 = vmatprep.subr.bf16.mxu1 %v8690_v0 }
 0x583   : > { %7840 = vmatpush3.bf16.msra.mxu1 %v9811_v52 }
 0x584   : > { %7841 = vmatprep.subr.bf16.mxu1 %v8690_v0 }
 0x587   : > { %7843 = vmatpush3.bf16.msra.mxu1 %v9823_v55 }
 0x588   : > { %7844 = vmatprep.subr.bf16.mxu1 %v8690_v0 }
 0x58b   : > { %7846 = vmatpush3.bf16.msra.mxu1 %v9835_v3 }
 0x58c   : > { %7847 = vmatprep.subr.bf16.mxu1 %v8690_v0 }
 0x58f   : > { %7849 = vmatpush3.bf16.msra.mxu1 %v9854_v35 }
 0x590   : > { %7850 = vmatprep.subr.bf16.mxu1 %v8690_v0 }
 0x593   : > { %7852 = vmatpush3.bf16.msra.mxu1 %v9870_v16 }
 0x594   : > { %7853 = vmatprep.subr.bf16.mxu1 %v8690_v0 }
 0x597   : > { %7855 = vmatpush3.bf16.msra.mxu1 %v9886_v62 }
 0x598   : > { %7856 = vmatprep.subr.bf16.mxu1 %v8690_v0 }
 0x59b   : > { %7858 = vmatpush3.bf16.msra.mxu1 %v9908_v7 }
 0x59e   : > { %7233 = vmatmul.mubr.f32.vlgmr.msra.gmra.mrb[28].mxu1 %v10101_v61 }
 0x671   : > { %v5178_v18 = vpop.f32.mrb[28].mxu1 }
 0x672   : > { %v10246_v21 = vsub.f32 %v10098_v42, %v5178_v18  ;;  %v7234_v22 = vpop.f32.mrb[29].mxu1 }
 0x674   : > { %v5183_v36 = vmul.f32 %v10246_v21, %v10246_v21 }
 0x676   : > { %v10250_v39 = vand.u32 4294901760, %v5183_v36 }
 0x678   : > { %v5266_v12 = vsub.f32 %v5183_v36, %v10250_v39 }
 0x67a   : > { %v5267_v40 = vand.u32 4294901760, %v5266_v12 }
 0x67c   : > { %v5268_v24 = vsub.f32 %v5266_v12, %v5267_v40 }
 0x67e   : > { %v5269_v38 = vand.u32 4294901760, %v5268_v24 }
 0x680   : > { %7268 = vmatmul.mubr.f32.vlgmr.msra.gmra.mrb[6].mxu0 %v5269_v38 }
 0x681   : > { %7885 = vmatpush3.bf16.msra.mxu0 %v9932_v25  ;;  %7302 = vmatprep.mubr.msk.f32.mxu0 %vm8691_vm0, %v8692_v1 }
 0x682   : > { %7886 = vmatprep.subr.bf16.mxu0 %v8690_v0 }
 0x685   : > { %7888 = vmatpush3.bf16.msra.mxu0 %v9952_v41 }
 0x686   : > { %7889 = vmatprep.subr.bf16.mxu0 %v8690_v0 }
 0x689   : > { %7891 = vmatpush3.bf16.msra.mxu0 %v9972_v48 }
 0x68a   : > { %7892 = vmatprep.subr.bf16.mxu0 %v8690_v0 }
 0x68d   : > { %7894 = vmatpush3.bf16.msra.mxu0 %v10008_v10 }
 0x68e   : > { %7895 = vmatprep.subr.bf16.mxu0 %v8690_v0 }
 0x691   : > { %7897 = vmatpush3.bf16.msra.mxu0 %v10012_v34 }
 0x692   : > { %7898 = vmatprep.subr.bf16.mxu0 %v8690_v0 }
 0x695   : > { %7900 = vmatpush3.bf16.msra.mxu0 %v10032_v50 }
 0x696   : > { %7901 = vmatprep.subr.bf16.mxu0 %v8690_v0 }
 0x699   : > { %7903 = vmatpush3.bf16.msra.mxu0 %v10058_v58 }
 0x69a   : > { %7904 = vmatprep.subr.bf16.mxu0 %v8690_v0 }
 0x69d   : > { %7906 = vmatpush3.bf16.msra.mxu0 %v10060_v13 }
 0x69e   : > { %7907 = vmatprep.subr.bf16.mxu0 %v8690_v0 }
 0x6a0   : > { %7303 = vmatmul.mubr.f32.vlgmr.msra.gmra.mrb[6].mxu0 %v10250_v39 }
 0x6a1   : > { %7909 = vmatpush3.bf16.msra.mxu0 %v10064_v26  ;;  %7337 = vmatprep.mubr.msk.f32.mxu0 %vm8691_vm0, %v8692_v1 }
 0x6a2   : > { %7910 = vmatprep.subr.bf16.mxu0 %v8690_v0 }
 0x6a5   : > { %7912 = vmatpush3.bf16.msra.mxu0 %v10068_v11 }
 0x6a6   : > { %7913 = vmatprep.subr.bf16.mxu0 %v8690_v0 }
 0x6a9   : > { %7915 = vmatpush3.bf16.msra.mxu0 %v10072_v28 }
 0x6aa   : > { %7916 = vmatprep.subr.bf16.mxu0 %v8690_v0 }
 0x6ad   : > { %7918 = vmatpush3.bf16.msra.mxu0 %v10076_v54 }
 0x6ae   : > { %7919 = vmatprep.subr.bf16.mxu0 %v8690_v0 }
 0x6b1   : > { %7921 = vmatpush3.bf16.msra.mxu0 %v10081_v47 }
 0x6b2   : > { %7922 = vmatprep.subr.bf16.mxu0 %v8690_v0 }
 0x6b5   : > { %7924 = vmatpush3.bf16.msra.mxu0 %v10085_v59 }
 0x6b6   : > { %7925 = vmatprep.subr.bf16.mxu0 %v8690_v0 }
 0x6b9   : > { %7927 = vmatpush3.bf16.msra.mxu0 %v10089_v6 }
 0x6ba   : > { %7928 = vmatprep.subr.bf16.mxu0 %v8690_v0 }
 0x6bd   : > { %7930 = vmatpush3.bf16.msra.mxu0 %v10093_v9 }
 0x6be   : > { %7931 = vmatprep.subr.bf16.mxu0 %v8690_v0 }
 0x6c0   : > { %7338 = vmatmul.mubr.f32.vlgmr.msra.gmra.mrb[6].mxu0 %v5266_v12 }
 0x6c1   : > { %7933 = vmatpush3.bf16.msra.mxu0 %v9790_v29  ;;  %7372 = vmatprep.mubr.msk.f32.mxu0 %vm8691_vm0, %v8692_v1 }
 0x6c2   : > { %7934 = vmatprep.subr.bf16.mxu0 %v8690_v0 }
 0x6c5   : > { %7936 = vmatpush3.bf16.msra.mxu0 %v9811_v52 }
 0x6c6   : > { %7937 = vmatprep.subr.bf16.mxu0 %v8690_v0 }
 0x6c9   : > { %7939 = vmatpush3.bf16.msra.mxu0 %v9823_v55 }
 0x6ca   : > { %7940 = vmatprep.subr.bf16.mxu0 %v8690_v0 }
 0x6cd   : > { %7942 = vmatpush3.bf16.msra.mxu0 %v9835_v3 }
 0x6ce   : > { %7943 = vmatprep.subr.bf16.mxu0 %v8690_v0 }
 0x6d1   : > { %7945 = vmatpush3.bf16.msra.mxu0 %v9854_v35 }
 0x6d2   : > { %7946 = vmatprep.subr.bf16.mxu0 %v8690_v0 }
 0x6d5   : > { %7948 = vmatpush3.bf16.msra.mxu0 %v9870_v16 }
 0x6d6   : > { %7949 = vmatprep.subr.bf16.mxu0 %v8690_v0 }
 0x6d9   : > { %7951 = vmatpush3.bf16.msra.mxu0 %v9886_v62 }
 0x6da   : > { %7952 = vmatprep.subr.bf16.mxu0 %v8690_v0 }
 0x6dd   : > { %7954 = vmatpush3.bf16.msra.mxu0 %v9908_v7 }
 0x6de   : > { %7955 = vmatprep.subr.bf16.mxu0 %v8690_v0 }
 0x6e0   : > { %7373 = vmatmul.mubr.f32.vlgmr.msra.gmra.mrb[6].mxu0 %v5267_v40 }
 0x6e1   : > { %7957 = vmatpush3.bf16.msra.mxu0 %v10163_v43  ;;  %7407 = vmatprep.mubr.msk.f32.mxu0 %vm8691_vm0, %v8692_v1 }
 0x6e2   : > { %7958 = vmatprep.subr.bf16.mxu0 %v8690_v0 }
 0x6e5   : > { %7960 = vmatpush3.bf16.msra.mxu0 %v10171_v45 }
 0x6e6   : > { %7961 = vmatprep.subr.bf16.mxu0 %v8690_v0 }
 0x6e9   : > { %7963 = vmatpush3.bf16.msra.mxu0 %v10181_v14 }
 0x6ea   : > { %7964 = vmatprep.subr.bf16.mxu0 %v8690_v0 }
 0x6ed   : > { %7966 = vmatpush3.bf16.msra.mxu0 %v10189_v37 }
 0x6ee   : > { %7967 = vmatprep.subr.bf16.mxu0 %v8690_v0 }
 0x6f1   : > { %7969 = vmatpush3.bf16.msra.mxu0 %v10197_v30 }
 0x6f2   : > { %7970 = vmatprep.subr.bf16.mxu0 %v8690_v0 }
 0x6f5   : > { %7972 = vmatpush3.bf16.msra.mxu0 %v10205_v33 }
 0x6f6   : > { %7973 = vmatprep.subr.bf16.mxu0 %v8690_v0 }
 0x6f9   : > { %7975 = vmatpush3.bf16.msra.mxu0 %v10213_v53 }
 0x6fa   : > { %7976 = vmatprep.subr.bf16.mxu0 %v8690_v0 }
 0x6fd   : > { %7978 = vmatpush3.bf16.msra.mxu0 %v10221_v5 }
 0x6fe   : > { %7979 = vmatprep.subr.bf16.mxu0 %v8690_v0 }
 0x700   : > { %7408 = vmatmul.mubr.f32.vlgmr.msra.gmra.mrb[6].mxu0 %v10250_v39 }
 0x701   : > { %7981 = vmatpush3.bf16.msra.mxu0 %v9790_v29  ;;  %7442 = vmatprep.mubr.msk.f32.mxu0 %vm8691_vm0, %v8692_v1 }
 0x702   : > { %7982 = vmatprep.subr.bf16.mxu0 %v8690_v0 }
 0x705   : > { %7984 = vmatpush3.bf16.msra.mxu0 %v9811_v52 }
 0x706   : > { %7985 = vmatprep.subr.bf16.mxu0 %v8690_v0 }
 0x709   : > { %7987 = vmatpush3.bf16.msra.mxu0 %v9823_v55 }
 0x70a   : > { %7988 = vmatprep.subr.bf16.mxu0 %v8690_v0 }
 0x70d   : > { %7990 = vmatpush3.bf16.msra.mxu0 %v9835_v3  ;;  %v6081_v3 = vld [vmem:[%s10598_s17] ss:$0 sm:$0xff] }
 0x70e   : > { %7991 = vmatprep.subr.bf16.mxu0 %v8690_v0 }
 0x711   : > { %7993 = vmatpush3.bf16.msra.mxu0 %v9854_v35 }
 0x712   : > { %7994 = vmatprep.subr.bf16.mxu0 %v8690_v0 }
 0x715   : > { %7996 = vmatpush3.bf16.msra.mxu0 %v9870_v16 }
 0x716   : > { %7997 = vmatprep.subr.bf16.mxu0 %v8690_v0 }
 0x719   : > { %7999 = vmatpush3.bf16.msra.mxu0 %v9886_v62 }
 0x71a   : > { %8000 = vmatprep.subr.bf16.mxu0 %v8690_v0  ;;  %v6082_v0 = vld [vmem:[%s10599_s25] ss:$0 sm:$0xff] }
 0x71d   : > { %8002 = vmatpush3.bf16.msra.mxu0 %v9908_v7 }
 0x720   : > { %7443 = vmatmul.mubr.f32.vlgmr.msra.gmra.mrb[6].mxu0 %v10250_v39 }
 0x7f3   : > { %v5821_v1 = vpop.f32.mrb[6].mxu0 }
 0x7f4   : > { %v8004_v29 = vadd.f32 1e-05, %v5821_v1  ;;  %v7444_v52 = vpop.f32.mrb[7].mxu0 }
 0x7f6   : > { %8277 = vrsqrt.f32 %v8004_v29 }
 0x800   : > { %v8278_v55 = vpop.eup %8277 }
 0x801   : > { %v5826_v35 = vmul.f32 %v8278_v55, %v10246_v21 }
 0x803   : > { %v5834_v16 = vmul.f32 %v6081_v3, %v5826_v35 }
 0x805   : > { %v5842_v62 = vadd.f32 %v6082_v0, %v5834_v16 }
 0x807   : > { %5843 = vst [vmem:[%s594_s20] sm:$0xff] %v5842_v62 }
 0x808   : > { %8524 = shalt.err (!%p8521_p6)
}
 0x809   : > { %s8525_s1 = scalar_lea.hbm %s10358_s12, 128  ;;  %s8529_s16 = scalar_lea.hbm %s10600_s10, 512 }
 0x80a   : > { %p8526_p8 = scmp.ne.s32.totalorder %s10358_s12, %s8525_s1  ;;  %p8530_p12 = scmp.lt.u32.totalorder %s10358_s12, %s10600_s10 }
 0x80b   : > { %p8531_p5 = scmp.lt.u32.totalorder %s8529_s16, %s8525_s1  ;;  %p8533_p3 = scmp.lt.u32.totalorder %s8525_s1, %s10358_s12 }
 0x80c   : > { %p8527_p10 = pnand %p8526_p8, %p10601_p9 }
 0x80d   : > { %p8532_p13 = por %p8531_p5, %p8530_p12 }
 0x80e   : > { %p8528_p11 = pneg %p8527_p10 }
 0x80f   : > { %p8534_p1 = por %p8533_p3, %p8532_p13 }
 0x811   : > { %p8535_p7 = pnand %p8534_p1, %p8528_p11 }
 0x813   : > { %8538 = shalt.err (!%p8535_p7)
}
 0x814   : > { %8113 = dma.vmem_to_hbm [thread:$0]  (%p10601_p9), %s10360_s15, 128, %s10358_s12, %s5845_s13  }
 0x815 PF: > { %s10602_s9 = sld [smem:[#allocation25_spill]]  ;;  %s10603_s27 = sld [smem:[#allocation39_spill]] }
 0x816   : > { %p8154_p4 = scmp.ge.s32.totalorder %s8677_s30, 2 }
 0x81b   : > { %s5872_s25 = sand.u32 1, %s10602_s9   ;;  %p10604_p0 = scmp.ne.s32.totalorder %s10603_s27, 0 }
 0x81c   : > { %s5873_s3 = scalar_lea.sflag [#allocation4], %s5872_s25 }
 0x81d   : > { %p8142_p2 = pnand %p8154_p4, %p10604_p0 }
 0x81f   : > { %8620 = dma.done.wait (!%p8142_p2), %s5873_s3, 128  }
 0x820   : > { %8622 = vsyncadd (!%p8142_p2), %s5873_s3, 4294967168  ;;  %s35_s30 = sadd.s32 1, %s8677_s30   ;;  %s10606_s17 = sld [smem:[#allocation24_spill]] }
 0x821   : > { %p10390_p6 = scmp.ge.s32.totalorder %s35_s30, 6   ;;  %s10607_s23 = sld [smem:[#allocation35_spill]] }
 0x822   : > { %s10608_s15 = sld [smem:[#allocation26_spill]]  ;;  %s10609_s22 = sld [smem:[#allocation36_spill]] }
 0x823   : > { %s10610_s14 = sld [smem:[#allocation28_spill]]  ;;  %s10611_s24 = sld [smem:[#allocation29_spill]] }
 0x824   : > { %s10612_s12 = sld [smem:[#allocation33_spill]]  ;;  %s10613_s13 = sld [smem:[#allocation34_spill]] }
 0x825   : > { %s10615_s18 = smov %s8633_s19  ;;  %s10617_s20 = smov %s8641_s21 }
 0x826   : > { %s10620_s25 = smov %s9088_s4  ;;  %s10621_s26 = smov %s8669_s28 }
 0x827   : > { %s10616_s19 = smov %s10607_s23  ;;  %s10622_s27 = smov %s8673_s29 }
 0x828   : > { %s10618_s21 = smov %s10608_s15  ;;  %34 = sbr.rel (!%p10390_p6) target bundleno = 28 (0x1c), region = 166 }
 0x829   : > { %s10619_s23 = smov %s10610_s14 }
 0x82a   : > { %s10623_s28 = smov %s10612_s12  ;;  %s10624_s29 = smov %s10613_s13 }
 0x82f   :  { %5878 = vsyncpa [#allocation3], 1 }
 0x830   :  { %5880 = vsyncpa [#allocation3 + $0x1], 1 }
 0x831   :  { %5881 = vsyncpa [#allocation6], 1 }
 0x832   :  { %5883 = vsyncpa [#allocation6 + $0x1], 1 }
 0x833   :  { %5884 = vsyncpa [#allocation9], 1 }
 0x834   :  { %5886 = vsyncpa [#allocation9 + $0x1], 1 }
 0x835   :  { %5887 = vsyncpa [#allocation12], 1 }
 0x836   :  { %5888 = vsyncpa [#allocation15], 1 }
 0x837   :  { %5889 = vsyncpa [#allocation4], 1 }
 0x838   :  { %5891 = vsyncpa [#allocation4 + $0x1], 1 }

</bundles_post_ra>
